<compile_context>
chip_gen: v6e
topology: v6e:2x2x1
jax: 0.10.0
libtpu: 0.0.40
codegen_flags: <defaults>
</compile_context>

<pallas_src>
import jax
import jax.numpy as jnp
from jax import lax
from jax.experimental import pallas as pl
from jax.experimental.pallas import tpu as pltpu

HIDDEN = 32          # hidden_size
VOCAB = 40           # output_size
MAX_LENGTH = 15      # max_length (number of encoder positions)
PAD_N = 128          # lane-dense padded width for the attention axis
MATMUL_DTYPE = jnp.bfloat16   # MXU operand dtype (jnp.float32 -> ~1e-5 agreement)

assert 4 * HIDDEN == PAD_N          # sigmoid/tanh of z are single full-128-lane EUP ops
assert MAX_LENGTH <= PAD_N


def attn_decoder_loop_kernel(
    pre_attn_ref,   # (T, PAD_N) f32 : emb@W_attn_e + b_attn, pad lanes = -1e30
    pre_cmb_ref,    # (T, H)     f32 : emb@W_cmb_e + b_cmb
    enc_ref,        # (PAD_N, H) bf16: encoder outputs, zero-padded rows
    h0_ref,         # (1, H) f32
    c0_ref,         # (1, H) f32
    Wah_ref,        # (H, PAD_N) bf16: hidden half of attn linear, zero-padded cols
    Wca_ref,        # (H, H)     bf16: attn_applied half of attn_combine
    Wl_ref,         # (2H, 4H)   bf16: fused [U; V], gates stacked (i, f, g, o)
    bl_ref,         # (1, 4H) f32
    attn_out_ref,   # (T, PAD_N) f32 out: per-step attention weights (pads are exactly 0)
    h_out_ref,      # (T, H)     f32 out: per-step hidden states
    c_out_ref,      # (1, H)     f32 out: final cell state
):
    T = pre_attn_ref.shape[0]
    H = h0_ref.shape[1]

    # Loop-invariant bias: load once above the loop (JAX does not CSE per-iter loads).
    b_lstm = bl_ref[...]                                            # (1, 4H)

    def step(t, carry):
        h_prev, c_prev = carry
        h_mm = h_prev.astype(MATMUL_DTYPE)

        # --- attention: only the h-dependent half is on the recurrent chain ---
        logits = pre_attn_ref[pl.ds(t, 1), :] + jnp.dot(
            h_mm, Wah_ref[...], preferred_element_type=jnp.float32)  # (1, PAD_N)
        m = jnp.max(logits, axis=1, keepdims=True)
        e = jnp.exp(logits - m)                  # -1e30 padding lanes underflow to exactly 0
        attn_w = e / jnp.sum(e, axis=1, keepdims=True)   # exact divide (correctness review)
        attn_out_ref[pl.ds(t, 1), :] = attn_w

        attn_applied = jnp.dot(attn_w.astype(MATMUL_DTYPE), enc_ref[...],
                               preferred_element_type=jnp.float32)   # (1, H)

        # --- attn_combine + relu: emb half precomputed, only attn_applied half here ---
        x = jnp.maximum(
            pre_cmb_ref[pl.ds(t, 1), :]
            + jnp.dot(attn_applied.astype(MATMUL_DTYPE), Wca_ref[...],
                      preferred_element_type=jnp.float32),
            0.0)                                                      # (1, H)

        # --- LSTM cell: single fused (1,2H)@(2H,4H) matmul (kept fused: MRF on v5e/v6e) ---
        xh = jnp.concatenate([x.astype(MATMUL_DTYPE), h_mm], axis=1)  # (1, 2H)
        z = jnp.dot(xh, Wl_ref[...],
                    preferred_element_type=jnp.float32) + b_lstm      # (1, 4H == 128)
        sig = jax.nn.sigmoid(z)          # one full-128-lane EUP op
        tah = jnp.tanh(z)                # one full-128-lane EUP op
        i_t = sig[:, 0 * H:1 * H]
        f_t = sig[:, 1 * H:2 * H]
        g_t = tah[:, 2 * H:3 * H]
        o_t = sig[:, 3 * H:4 * H]
        c_t = f_t * c_prev + i_t * g_t
        h_t = o_t * jnp.tanh(c_t)
        h_out_ref[pl.ds(t, 1), :] = h_t
        return (h_t, c_t)

    _, c_T = lax.fori_loop(0, T, step, (h0_ref[...], c0_ref[...]), unroll=True)
    c_out_ref[...] = c_T


def pack_params(p):
    """Host-side, one-time: lane-pad and fuse the recurrent-chain weights (bf16 MXU operands)."""
    Wah = jnp.pad(p["attn_Wh"], ((0, 0), (0, PAD_N - MAX_LENGTH))).astype(MATMUL_DTYPE)
    Wca = p["cmb_Wa"].astype(MATMUL_DTYPE)
    Wl = jnp.concatenate([p["U"], p["Vm"]], axis=0).astype(MATMUL_DTYPE)       # (2H, 4H)
    bl = p["b"].astype(jnp.float32)                                            # (1, 4H)
    return {"Wah": Wah, "Wca": Wca, "Wl": Wl, "bl": bl}


def _vmem_spec():
    return pl.BlockSpec(memory_space=pltpu.MemorySpace.VMEM)


def _forward_seq(tokens, hidden, encoder_outputs, params):
    h0, c0 = hidden
    h0 = jnp.reshape(h0, (1, HIDDEN)).astype(jnp.float32)
    c0 = jnp.reshape(c0, (1, HIDDEN)).astype(jnp.float32)
    tokens = jnp.asarray(tokens, jnp.int32).reshape(-1)
    T = tokens.shape[0]
    H, V, L = HIDDEN, VOCAB, MAX_LENGTH

    kp = pack_params(params)

    # ---- batched, non-recurrent PROLOGUE (left to XLA; second core / overlap on v7x) ----
    tok = jnp.clip(tokens, 0, V - 1)                 # guard untrusted token ids
    emb = jnp.take(params["emb"], tok, axis=0)       # (T, H) embedding gather
    # TODO(synk): nn.Dropout(p=0.1) on the embedding is treated as identity (eval mode).
    pre_attn = emb @ params["attn_We"] + params["attn_b"]                      # (T, L)
    pre_attn = jnp.pad(pre_attn, ((0, 0), (0, PAD_N - L)),
                       constant_values=-1e30).astype(jnp.float32)              # (T, 128)
    pre_cmb = (emb @ params["cmb_We"] + params["cmb_b"]).astype(jnp.float32)   # (T, H)
    enc_pad = jnp.pad(encoder_outputs.astype(jnp.float32),
                      ((0, PAD_N - L), (0, 0))).astype(MATMUL_DTYPE)           # (128, H)

    # ---- the recurrent chain: ONE pallas_call, in-kernel fori_loop over T ----
    attn_all, h_all, c_T = pl.pallas_call(
        attn_decoder_loop_kernel,
        out_shape=(jax.ShapeDtypeStruct((T, PAD_N), jnp.float32),
                   jax.ShapeDtypeStruct((T, H), jnp.float32),
                   jax.ShapeDtypeStruct((1, H), jnp.float32)),
        in_specs=[_vmem_spec() for _ in range(9)],
        out_specs=(_vmem_spec(), _vmem_spec(), _vmem_spec()),
    )(pre_attn, pre_cmb, enc_pad, h0, c0, kp["Wah"], kp["Wca"], kp["Wl"], kp["bl"])

    # ---- batched EPILOGUE: output head + log_softmax over all T steps at once ----
    logp = jax.nn.log_softmax(h_all @ params["out_W"] + params["out_b"], axis=1)  # (T, V)
    attn_w = attn_all[:, :L]                                                      # (T, L)
    h_T = h_all[T - 1:T].reshape(1, 1, H)
    c_T = c_T.reshape(1, 1, H)
    return logp, (h_T, c_T), attn_w


attn_decoder_forward_seq = jax.jit(_forward_seq)


def attn_decoder_forward(token, hidden, encoder_outputs, params):
    """Single decoder step (the original module's forward signature)."""
    tok = jnp.reshape(jnp.asarray(token, jnp.int32), (1,))
    return attn_decoder_forward_seq(tok, hidden, encoder_outputs, params)


def init_params(key):
    H, V, L = HIDDEN, VOCAB, MAX_LENGTH
    ks = list(jax.random.split(key, 18))
    stdv = 1.0 / jnp.sqrt(jnp.float32(H))
    b2h = 1.0 / jnp.sqrt(2.0 * H)

    def u(k, shape, bound):
        return jax.random.uniform(k, shape, jnp.float32, -bound, bound)

    return {
        "emb": jax.random.normal(ks[0], (V, H), jnp.float32),
        # attn: Linear(2H -> L), split into embedded-half and hidden-half
        "attn_We": u(ks[1], (H, L), b2h),
        "attn_Wh": u(ks[2], (H, L), b2h),
        "attn_b":  u(ks[3], (1, L), b2h),
        # attn_combine: Linear(2H -> H)
        "cmb_We": u(ks[4], (H, H), b2h),
        "cmb_Wa": u(ks[5], (H, H), b2h),
        "cmb_b":  u(ks[6], (1, H), b2h),
        # LSTM gates stacked (i, f, g, o) along output axis
        "U":  jnp.concatenate([u(ks[7 + j], (H, H), stdv) for j in range(4)], axis=1),
        "Vm": jnp.concatenate([u(ks[11 + j], (H, H), stdv) for j in range(4)], axis=1),
        "b":  u(ks[15], (1, 4 * H), stdv),
        # out: Linear(H -> V)
        "out_W": u(ks[16], (H, V), stdv),
        "out_b": u(ks[17], (1, V), stdv),
    }


def reference_step(token, hidden, encoder_outputs, p):
    """Pure-JAX f32 reference mirroring one PyTorch forward (eval-mode dropout)."""
    H = HIDDEN
    h0, c0 = hidden
    emb = p["emb"][token][None, :]
    attn_logits = emb @ p["attn_We"] + h0 @ p["attn_Wh"] + p["attn_b"]
    attn_w = jax.nn.softmax(attn_logits, axis=1)
    attn_applied = attn_w @ encoder_outputs
    x = jax.nn.relu(emb @ p["cmb_We"] + attn_applied @ p["cmb_Wa"] + p["cmb_b"])
    z = x @ p["U"] + h0 @ p["Vm"] + p["b"]
    i_t = jax.nn.sigmoid(z[:, :H])
    f_t = jax.nn.sigmoid(z[:, H:2 * H])
    g_t = jnp.tanh(z[:, 2 * H:3 * H])
    o_t = jax.nn.sigmoid(z[:, 3 * H:])
    c_t = f_t * c0 + i_t * g_t
    h_t = o_t * jnp.tanh(c_t)
    logp = jax.nn.log_softmax(h_t @ p["out_W"] + p["out_b"], axis=1)
    return logp, (h_t, c_t), attn_w


def reference_seq(tokens, hidden, encoder_outputs, p):
    h, c = hidden
    logps, attws = [], []
    for tok in list(tokens):
        logp, (h, c), aw = reference_step(int(tok), (h, c), encoder_outputs, p)
        logps.append(logp)
        attws.append(aw)
    return jnp.concatenate(logps, axis=0), (h, c), jnp.concatenate(attws, axis=0)


if __name__ == "__main__":
    key = jax.random.PRNGKey(0)
    k_par, k_enc, k_tok = jax.random.split(key, 3)

    params = init_params(k_par)
    T = 8
    tokens = jax.random.randint(k_tok, (T,), 0, VOCAB, dtype=jnp.int32)
    h0 = jnp.zeros((1, HIDDEN), jnp.float32)
    c0 = jnp.zeros((1, HIDDEN), jnp.float32)
    encoder_outputs = jax.random.normal(k_enc, (MAX_LENGTH, HIDDEN), jnp.float32)

    # Whole teacher-forced decode sequence: one kernel invocation, in-kernel loop.
    logp, (h_T, c_T), attn_w = attn_decoder_forward_seq(
        tokens, (h0, c0), encoder_outputs, params)
    jax.block_until_ready((logp, h_T, c_T, attn_w))

    r_logp, (r_h, r_c), r_aw = reference_seq(tokens, (h0, c0), encoder_outputs, params)

    # The softmax divide is now exact; the remaining deviation from the f32
    # reference comes solely from bf16 MXU operands on the recurrent chain
    # (accumulated over T steps).  Setting MATMUL_DTYPE = jnp.float32 recovers
    # ~1e-5 agreement; structural bugs produce errors orders of magnitude larger.
    tol = dict(atol=2e-2)
    assert jnp.allclose(logp, r_logp, **tol), "log_softmax mismatch"
    assert jnp.allclose(attn_w, r_aw, **tol), "attn_weights mismatch"
    assert jnp.allclose(h_T.reshape(1, HIDDEN), r_h, **tol), "h mismatch"
    assert jnp.allclose(c_T.reshape(1, HIDDEN), r_c, **tol), "c mismatch"

    # Single-step path (original module forward signature) still works.
    logp1, (h1, c1), aw1 = attn_decoder_forward(
        tokens[0], (h0, c0), encoder_outputs, params)
    jax.block_until_ready((logp1, h1, c1, aw1))
    s_logp, (s_h, s_c), s_aw = reference_step(
        int(tokens[0]), (h0, c0), encoder_outputs, params)
    assert jnp.allclose(logp1, s_logp, **tol), "step log_softmax mismatch"
    assert jnp.allclose(aw1, s_aw, **tol), "step attn_weights mismatch"
    assert jnp.allclose(h1.reshape(1, HIDDEN), s_h, **tol), "step h mismatch"
    assert jnp.allclose(c1.reshape(1, HIDDEN), s_c, **tol), "step c mismatch"

    print("KERNEL_OK")
</pallas_src>

<mosaic_0001>
module attributes {stable_mosaic.version = 11 : i64} {
  func.func @attn_decoder_loop_kernel(%arg0: memref<8x128xf32, #tpu.memory_space<vmem>>, %arg1: memref<8x32xf32, #tpu.memory_space<vmem>>, %arg2: memref<128x32xbf16, #tpu.memory_space<vmem>>, %arg3: memref<1x32xf32, #tpu.memory_space<vmem>>, %arg4: memref<1x32xf32, #tpu.memory_space<vmem>>, %arg5: memref<32x128xbf16, #tpu.memory_space<vmem>>, %arg6: memref<32x32xbf16, #tpu.memory_space<vmem>>, %arg7: memref<64x128xbf16, #tpu.memory_space<vmem>>, %arg8: memref<1x128xf32, #tpu.memory_space<vmem>>, %arg9: memref<8x128xf32, #tpu.memory_space<vmem>>, %arg10: memref<8x32xf32, #tpu.memory_space<vmem>>, %arg11: memref<1x32xf32, #tpu.memory_space<vmem>>) attributes {dimension_semantics = [], scalar_prefetch = 0 : i64, scratch_operands = 0 : i64, tpu.core_type = #tpu.core_type<tc>} {
    %c0 = arith.constant 0 : index
    %c0_0 = arith.constant 0 : index
    %0 = vector.load %arg8[%c0, %c0_0] : memref<1x128xf32, #tpu.memory_space<vmem>>, vector<1x128xf32>
    %c0_1 = arith.constant 0 : index
    %c0_2 = arith.constant 0 : index
    %1 = vector.load %arg3[%c0_1, %c0_2] : memref<1x32xf32, #tpu.memory_space<vmem>>, vector<1x32xf32>
    %c0_3 = arith.constant 0 : index
    %c0_4 = arith.constant 0 : index
    %2 = vector.load %arg4[%c0_3, %c0_4] : memref<1x32xf32, #tpu.memory_space<vmem>>, vector<1x32xf32>
    %c0_i32 = arith.constant 0 : i32
    %3 = arith.truncf %1 : vector<1x32xf32> to vector<1x32xbf16>
    %4 = arith.index_cast %c0_i32 : i32 to index
    %c0_5 = arith.constant 0 : index
    %5 = vector.load %arg0[%4, %c0_5] : memref<8x128xf32, #tpu.memory_space<vmem>>, vector<1x128xf32>
    %c0_6 = arith.constant 0 : index
    %c0_7 = arith.constant 0 : index
    %6 = vector.load %arg5[%c0_6, %c0_7] : memref<32x128xbf16, #tpu.memory_space<vmem>>, vector<32x128xbf16>
    %cst = arith.constant dense<0.000000e+00> : vector<1x128xf32>
    %7 = tpu.matmul %3, %6, %cst {dimension_numbers = #tpu.dot_dimension_numbers<[1], [0], [0], [1], [0, 0, 1, 1], [], []>} : vector<1x32xbf16>, vector<32x128xbf16>, vector<1x128xf32> -> vector<1x128xf32>
    %8 = arith.addf %5, %7 : vector<1x128xf32>
    %cst_8 = arith.constant dense<0xFF800000> : vector<1xf32>
    %9 = vector.multi_reduction <maximumf>, %8, %cst_8 [1] : vector<1x128xf32> to vector<1xf32>
    %10 = vector.shape_cast %9 : vector<1xf32> to vector<1x1xf32>
    %11 = vector.broadcast %10 : vector<1x1xf32> to vector<1x128xf32>
    %12 = arith.subf %8, %11 : vector<1x128xf32>
    %13 = math.exp %12 : vector<1x128xf32>
    %cst_9 = arith.constant dense<0.000000e+00> : vector<1xf32>
    %14 = vector.multi_reduction <add>, %13, %cst_9 [1] : vector<1x128xf32> to vector<1xf32>
    %15 = vector.shape_cast %14 : vector<1xf32> to vector<1x1xf32>
    %16 = vector.broadcast %15 : vector<1x1xf32> to vector<1x128xf32>
    %17 = arith.divf %13, %16 : vector<1x128xf32>
    %18 = arith.index_cast %c0_i32 : i32 to index
    %c0_10 = arith.constant 0 : index
    %19 = vector.load %arg9[%18, %c0_10] : memref<8x128xf32, #tpu.memory_space<vmem>>, vector<1x128xf32>
    tpu.vector_store %arg9[%18, %c0_10], %17 {strides = array<i32>} : memref<8x128xf32, #tpu.memory_space<vmem>>, vector<1x128xf32>,
    %20 = arith.truncf %17 : vector<1x128xf32> to vector<1x128xbf16>
    %c0_11 = arith.constant 0 : index
    %c0_12 = arith.constant 0 : index
    %21 = vector.load %arg2[%c0_11, %c0_12] : memref<128x32xbf16, #tpu.memory_space<vmem>>, vector<128x32xbf16>
    %cst_13 = arith.constant dense<0.000000e+00> : vector<1x32xf32>
    %22 = tpu.matmul %20, %21, %cst_13 {dimension_numbers = #tpu.dot_dimension_numbers<[1], [0], [0], [1], [0, 0, 1, 1], [], []>} : vector<1x128xbf16>, vector<128x32xbf16>, vector<1x32xf32> -> vector<1x32xf32>
    %23 = arith.index_cast %c0_i32 : i32 to index
    %c0_14 = arith.constant 0 : index
    %24 = vector.load %arg1[%23, %c0_14] : memref<8x32xf32, #tpu.memory_space<vmem>>, vector<1x32xf32>
    %25 = arith.truncf %22 : vector<1x32xf32> to vector<1x32xbf16>
    %c0_15 = arith.constant 0 : index
    %c0_16 = arith.constant 0 : index
    %26 = vector.load %arg6[%c0_15, %c0_16] : memref<32x32xbf16, #tpu.memory_space<vmem>>, vector<32x32xbf16>
    %cst_17 = arith.constant dense<0.000000e+00> : vector<1x32xf32>
    %27 = tpu.matmul %25, %26, %cst_17 {dimension_numbers = #tpu.dot_dimension_numbers<[1], [0], [0], [1], [0, 0, 1, 1], [], []>} : vector<1x32xbf16>, vector<32x32xbf16>, vector<1x32xf32> -> vector<1x32xf32>
    %28 = arith.addf %24, %27 : vector<1x32xf32>
    %cst_18 = arith.constant 0.000000e+00 : f32
    %29 = vector.broadcast %cst_18 : f32 to vector<1x32xf32>
    %30 = arith.maximumf %28, %29 : vector<1x32xf32>
    %31 = arith.truncf %30 : vector<1x32xf32> to vector<1x32xbf16>
    %32 = tpu.concatenate %31, %3 in 1 : vector<1x32xbf16>, vector<1x32xbf16> -> vector<1x64xbf16>
    %c0_19 = arith.constant 0 : index
    %c0_20 = arith.constant 0 : index
    %33 = vector.load %arg7[%c0_19, %c0_20] : memref<64x128xbf16, #tpu.memory_space<vmem>>, vector<64x128xbf16>
    %cst_21 = arith.constant dense<0.000000e+00> : vector<1x128xf32>
    %34 = tpu.matmul %32, %33, %cst_21 {dimension_numbers = #tpu.dot_dimension_numbers<[1], [0], [0], [1], [0, 0, 1, 1], [], []>} : vector<1x64xbf16>, vector<64x128xbf16>, vector<1x128xf32> -> vector<1x128xf32>
    %35 = arith.addf %34, %0 : vector<1x128xf32>
    %36 = arith.negf %35 : vector<1x128xf32>
    %37 = math.exp %36 : vector<1x128xf32>
    %cst_22 = arith.constant 1.000000e+00 : f32
    %38 = vector.broadcast %cst_22 : f32 to vector<1x128xf32>
    %39 = arith.addf %38, %37 : vector<1x128xf32>
    %40 = arith.divf %38, %39 : vector<1x128xf32>
    %41 = math.tanh %35 : vector<1x128xf32>
    %42 = vector.extract_strided_slice %40 {offsets = [0, 0], sizes = [1, 32], strides = [1, 1]} : vector<1x128xf32> to vector<1x32xf32>
    %43 = vector.extract_strided_slice %40 {offsets = [0, 32], sizes = [1, 32], strides = [1, 1]} : vector<1x128xf32> to vector<1x32xf32>
    %44 = vector.extract_strided_slice %41 {offsets = [0, 64], sizes = [1, 32], strides = [1, 1]} : vector<1x128xf32> to vector<1x32xf32>
    %45 = vector.extract_strided_slice %40 {offsets = [0, 96], sizes = [1, 32], strides = [1, 1]} : vector<1x128xf32> to vector<1x32xf32>
    %46 = arith.mulf %43, %2 : vector<1x32xf32>
    %47 = arith.mulf %42, %44 : vector<1x32xf32>
    %48 = arith.addf %46, %47 : vector<1x32xf32>
    %49 = math.tanh %48 : vector<1x32xf32>
    %50 = arith.mulf %45, %49 : vector<1x32xf32>
    %51 = arith.index_cast %c0_i32 : i32 to index
    %c0_23 = arith.constant 0 : index
    %52 = vector.load %arg10[%51, %c0_23] : memref<8x32xf32, #tpu.memory_space<vmem>>, vector<1x32xf32>
    tpu.vector_store %arg10[%51, %c0_23], %50 {strides = array<i32>} : memref<8x32xf32, #tpu.memory_space<vmem>>, vector<1x32xf32>,
    %c1_i32 = arith.constant 1 : i32
    %53 = arith.truncf %50 : vector<1x32xf32> to vector<1x32xbf16>
    %54 = arith.index_cast %c1_i32 : i32 to index
    %c0_24 = arith.constant 0 : index
    %55 = vector.load %arg0[%54, %c0_24] : memref<8x128xf32, #tpu.memory_space<vmem>>, vector<1x128xf32>
    %c0_25 = arith.constant 0 : index
    %c0_26 = arith.constant 0 : index
    %56 = vector.load %arg5[%c0_25, %c0_26] : memref<32x128xbf16, #tpu.memory_space<vmem>>, vector<32x128xbf16>
    %cst_27 = arith.constant dense<0.000000e+00> : vector<1x128xf32>
    %57 = tpu.matmul %53, %56, %cst_27 {dimension_numbers = #tpu.dot_dimension_numbers<[1], [0], [0], [1], [0, 0, 1, 1], [], []>} : vector<1x32xbf16>, vector<32x128xbf16>, vector<1x128xf32> -> vector<1x128xf32>
    %58 = arith.addf %55, %57 : vector<1x128xf32>
    %cst_28 = arith.constant dense<0xFF800000> : vector<1xf32>
    %59 = vector.multi_reduction <maximumf>, %58, %cst_28 [1] : vector<1x128xf32> to vector<1xf32>
    %60 = vector.shape_cast %59 : vector<1xf32> to vector<1x1xf32>
    %61 = vector.broadcast %60 : vector<1x1xf32> to vector<1x128xf32>
    %62 = arith.subf %58, %61 : vector<1x128xf32>
    %63 = math.exp %62 : vector<1x128xf32>
    %cst_29 = arith.constant dense<0.000000e+00> : vector<1xf32>
    %64 = vector.multi_reduction <add>, %63, %cst_29 [1] : vector<1x128xf32> to vector<1xf32>
    %65 = vector.shape_cast %64 : vector<1xf32> to vector<1x1xf32>
    %66 = vector.broadcast %65 : vector<1x1xf32> to vector<1x128xf32>
    %67 = arith.divf %63, %66 : vector<1x128xf32>
    %68 = arith.index_cast %c1_i32 : i32 to index
    %c0_30 = arith.constant 0 : index
    %69 = vector.load %arg9[%68, %c0_30] : memref<8x128xf32, #tpu.memory_space<vmem>>, vector<1x128xf32>
    tpu.vector_store %arg9[%68, %c0_30], %67 {strides = array<i32>} : memref<8x128xf32, #tpu.memory_space<vmem>>, vector<1x128xf32>,
    %70 = arith.truncf %67 : vector<1x128xf32> to vector<1x128xbf16>
    %c0_31 = arith.constant 0 : index
    %c0_32 = arith.constant 0 : index
    %71 = vector.load %arg2[%c0_31, %c0_32] : memref<128x32xbf16, #tpu.memory_space<vmem>>, vector<128x32xbf16>
    %cst_33 = arith.constant dense<0.000000e+00> : vector<1x32xf32>
    %72 = tpu.matmul %70, %71, %cst_33 {dimension_numbers = #tpu.dot_dimension_numbers<[1], [0], [0], [1], [0, 0, 1, 1], [], []>} : vector<1x128xbf16>, vector<128x32xbf16>, vector<1x32xf32> -> vector<1x32xf32>
    %73 = arith.index_cast %c1_i32 : i32 to index
    %c0_34 = arith.constant 0 : index
    %74 = vector.load %arg1[%73, %c0_34] : memref<8x32xf32, #tpu.memory_space<vmem>>, vector<1x32xf32>
    %75 = arith.truncf %72 : vector<1x32xf32> to vector<1x32xbf16>
    %c0_35 = arith.constant 0 : index
    %c0_36 = arith.constant 0 : index
    %76 = vector.load %arg6[%c0_35, %c0_36] : memref<32x32xbf16, #tpu.memory_space<vmem>>, vector<32x32xbf16>
    %cst_37 = arith.constant dense<0.000000e+00> : vector<1x32xf32>
    %77 = tpu.matmul %75, %76, %cst_37 {dimension_numbers = #tpu.dot_dimension_numbers<[1], [0], [0], [1], [0, 0, 1, 1], [], []>} : vector<1x32xbf16>, vector<32x32xbf16>, vector<1x32xf32> -> vector<1x32xf32>
    %78 = arith.addf %74, %77 : vector<1x32xf32>
    %cst_38 = arith.constant 0.000000e+00 : f32
    %79 = vector.broadcast %cst_38 : f32 to vector<1x32xf32>
    %80 = arith.maximumf %78, %79 : vector<1x32xf32>
    %81 = arith.truncf %80 : vector<1x32xf32> to vector<1x32xbf16>
    %82 = tpu.concatenate %81, %53 in 1 : vector<1x32xbf16>, vector<1x32xbf16> -> vector<1x64xbf16>
    %c0_39 = arith.constant 0 : index
    %c0_40 = arith.constant 0 : index
    %83 = vector.load %arg7[%c0_39, %c0_40] : memref<64x128xbf16, #tpu.memory_space<vmem>>, vector<64x128xbf16>
    %cst_41 = arith.constant dense<0.000000e+00> : vector<1x128xf32>
    %84 = tpu.matmul %82, %83, %cst_41 {dimension_numbers = #tpu.dot_dimension_numbers<[1], [0], [0], [1], [0, 0, 1, 1], [], []>} : vector<1x64xbf16>, vector<64x128xbf16>, vector<1x128xf32> -> vector<1x128xf32>
    %85 = arith.addf %84, %0 : vector<1x128xf32>
    %86 = arith.negf %85 : vector<1x128xf32>
    %87 = math.exp %86 : vector<1x128xf32>
    %cst_42 = arith.constant 1.000000e+00 : f32
    %88 = vector.broadcast %cst_42 : f32 to vector<1x128xf32>
    %89 = arith.addf %88, %87 : vector<1x128xf32>
    %90 = arith.divf %88, %89 : vector<1x128xf32>
    %91 = math.tanh %85 : vector<1x128xf32>
    %92 = vector.extract_strided_slice %90 {offsets = [0, 0], sizes = [1, 32], strides = [1, 1]} : vector<1x128xf32> to vector<1x32xf32>
    %93 = vector.extract_strided_slice %90 {offsets = [0, 32], sizes = [1, 32], strides = [1, 1]} : vector<1x128xf32> to vector<1x32xf32>
    %94 = vector.extract_strided_slice %91 {offsets = [0, 64], sizes = [1, 32], strides = [1, 1]} : vector<1x128xf32> to vector<1x32xf32>
    %95 = vector.extract_strided_slice %90 {offsets = [0, 96], sizes = [1, 32], strides = [1, 1]} : vector<1x128xf32> to vector<1x32xf32>
    %96 = arith.mulf %93, %48 : vector<1x32xf32>
    %97 = arith.mulf %92, %94 : vector<1x32xf32>
    %98 = arith.addf %96, %97 : vector<1x32xf32>
    %99 = math.tanh %98 : vector<1x32xf32>
    %100 = arith.mulf %95, %99 : vector<1x32xf32>
    %101 = arith.index_cast %c1_i32 : i32 to index
    %c0_43 = arith.constant 0 : index
    %102 = vector.load %arg10[%101, %c0_43] : memref<8x32xf32, #tpu.memory_space<vmem>>, vector<1x32xf32>
    tpu.vector_store %arg10[%101, %c0_43], %100 {strides = array<i32>} : memref<8x32xf32, #tpu.memory_space<vmem>>, vector<1x32xf32>,
    %c2_i32 = arith.constant 2 : i32
    %103 = arith.truncf %100 : vector<1x32xf32> to vector<1x32xbf16>
    %104 = arith.index_cast %c2_i32 : i32 to index
    %c0_44 = arith.constant 0 : index
    %105 = vector.load %arg0[%104, %c0_44] : memref<8x128xf32, #tpu.memory_space<vmem>>, vector<1x128xf32>
    %c0_45 = arith.constant 0 : index
    %c0_46 = arith.constant 0 : index
    %106 = vector.load %arg5[%c0_45, %c0_46] : memref<32x128xbf16, #tpu.memory_space<vmem>>, vector<32x128xbf16>
    %cst_47 = arith.constant dense<0.000000e+00> : vector<1x128xf32>
    %107 = tpu.matmul %103, %106, %cst_47 {dimension_numbers = #tpu.dot_dimension_numbers<[1], [0], [0], [1], [0, 0, 1, 1], [], []>} : vector<1x32xbf16>, vector<32x128xbf16>, vector<1x128xf32> -> vector<1x128xf32>
    %108 = arith.addf %105, %107 : vector<1x128xf32>
    %cst_48 = arith.constant dense<0xFF800000> : vector<1xf32>
    %109 = vector.multi_reduction <maximumf>, %108, %cst_48 [1] : vector<1x128xf32> to vector<1xf32>
    %110 = vector.shape_cast %109 : vector<1xf32> to vector<1x1xf32>
    %111 = vector.broadcast %110 : vector<1x1xf32> to vector<1x128xf32>
    %112 = arith.subf %108, %111 : vector<1x128xf32>
    %113 = math.exp %112 : vector<1x128xf32>
    %cst_49 = arith.constant dense<0.000000e+00> : vector<1xf32>
    %114 = vector.multi_reduction <add>, %113, %cst_49 [1] : vector<1x128xf32> to vector<1xf32>
    %115 = vector.shape_cast %114 : vector<1xf32> to vector<1x1xf32>
    %116 = vector.broadcast %115 : vector<1x1xf32> to vector<1x128xf32>
    %117 = arith.divf %113, %116 : vector<1x128xf32>
    %118 = arith.index_cast %c2_i32 : i32 to index
    %c0_50 = arith.constant 0 : index
    %119 = vector.load %arg9[%118, %c0_50] : memref<8x128xf32, #tpu.memory_space<vmem>>, vector<1x128xf32>
    tpu.vector_store %arg9[%118, %c0_50], %117 {strides = array<i32>} : memref<8x128xf32, #tpu.memory_space<vmem>>, vector<1x128xf32>,
    %120 = arith.truncf %117 : vector<1x128xf32> to vector<1x128xbf16>
    %c0_51 = arith.constant 0 : index
    %c0_52 = arith.constant 0 : index
    %121 = vector.load %arg2[%c0_51, %c0_52] : memref<128x32xbf16, #tpu.memory_space<vmem>>, vector<128x32xbf16>
    %cst_53 = arith.constant dense<0.000000e+00> : vector<1x32xf32>
    %122 = tpu.matmul %120, %121, %cst_53 {dimension_numbers = #tpu.dot_dimension_numbers<[1], [0], [0], [1], [0, 0, 1, 1], [], []>} : vector<1x128xbf16>, vector<128x32xbf16>, vector<1x32xf32> -> vector<1x32xf32>
    %123 = arith.index_cast %c2_i32 : i32 to index
    %c0_54 = arith.constant 0 : index
    %124 = vector.load %arg1[%123, %c0_54] : memref<8x32xf32, #tpu.memory_space<vmem>>, vector<1x32xf32>
    %125 = arith.truncf %122 : vector<1x32xf32> to vector<1x32xbf16>
    %c0_55 = arith.constant 0 : index
    %c0_56 = arith.constant 0 : index
    %126 = vector.load %arg6[%c0_55, %c0_56] : memref<32x32xbf16, #tpu.memory_space<vmem>>, vector<32x32xbf16>
    %cst_57 = arith.constant dense<0.000000e+00> : vector<1x32xf32>
    %127 = tpu.matmul %125, %126, %cst_57 {dimension_numbers = #tpu.dot_dimension_numbers<[1], [0], [0], [1], [0, 0, 1, 1], [], []>} : vector<1x32xbf16>, vector<32x32xbf16>, vector<1x32xf32> -> vector<1x32xf32>
    %128 = arith.addf %124, %127 : vector<1x32xf32>
    %cst_58 = arith.constant 0.000000e+00 : f32
    %129 = vector.broadcast %cst_58 : f32 to vector<1x32xf32>
    %130 = arith.maximumf %128, %129 : vector<1x32xf32>
    %131 = arith.truncf %130 : vector<1x32xf32> to vector<1x32xbf16>
    %132 = tpu.concatenate %131, %103 in 1 : vector<1x32xbf16>, vector<1x32xbf16> -> vector<1x64xbf16>
    %c0_59 = arith.constant 0 : index
    %c0_60 = arith.constant 0 : index
    %133 = vector.load %arg7[%c0_59, %c0_60] : memref<64x128xbf16, #tpu.memory_space<vmem>>, vector<64x128xbf16>
    %cst_61 = arith.constant dense<0.000000e+00> : vector<1x128xf32>
    %134 = tpu.matmul %132, %133, %cst_61 {dimension_numbers = #tpu.dot_dimension_numbers<[1], [0], [0], [1], [0, 0, 1, 1], [], []>} : vector<1x64xbf16>, vector<64x128xbf16>, vector<1x128xf32> -> vector<1x128xf32>
    %135 = arith.addf %134, %0 : vector<1x128xf32>
    %136 = arith.negf %135 : vector<1x128xf32>
    %137 = math.exp %136 : vector<1x128xf32>
    %cst_62 = arith.constant 1.000000e+00 : f32
    %138 = vector.broadcast %cst_62 : f32 to vector<1x128xf32>
    %139 = arith.addf %138, %137 : vector<1x128xf32>
    %140 = arith.divf %138, %139 : vector<1x128xf32>
    %141 = math.tanh %135 : vector<1x128xf32>
    %142 = vector.extract_strided_slice %140 {offsets = [0, 0], sizes = [1, 32], strides = [1, 1]} : vector<1x128xf32> to vector<1x32xf32>
    %143 = vector.extract_strided_slice %140 {offsets = [0, 32], sizes = [1, 32], strides = [1, 1]} : vector<1x128xf32> to vector<1x32xf32>
    %144 = vector.extract_strided_slice %141 {offsets = [0, 64], sizes = [1, 32], strides = [1, 1]} : vector<1x128xf32> to vector<1x32xf32>
    %145 = vector.extract_strided_slice %140 {offsets = [0, 96], sizes = [1, 32], strides = [1, 1]} : vector<1x128xf32> to vector<1x32xf32>
    %146 = arith.mulf %143, %98 : vector<1x32xf32>
    %147 = arith.mulf %142, %144 : vector<1x32xf32>
    %148 = arith.addf %146, %147 : vector<1x32xf32>
    %149 = math.tanh %148 : vector<1x32xf32>
    %150 = arith.mulf %145, %149 : vector<1x32xf32>
    %151 = arith.index_cast %c2_i32 : i32 to index
    %c0_63 = arith.constant 0 : index
    %152 = vector.load %arg10[%151, %c0_63] : memref<8x32xf32, #tpu.memory_space<vmem>>, vector<1x32xf32>
    tpu.vector_store %arg10[%151, %c0_63], %150 {strides = array<i32>} : memref<8x32xf32, #tpu.memory_space<vmem>>, vector<1x32xf32>,
    %c3_i32 = arith.constant 3 : i32
    %153 = arith.truncf %150 : vector<1x32xf32> to vector<1x32xbf16>
    %154 = arith.index_cast %c3_i32 : i32 to index
    %c0_64 = arith.constant 0 : index
    %155 = vector.load %arg0[%154, %c0_64] : memref<8x128xf32, #tpu.memory_space<vmem>>, vector<1x128xf32>
    %c0_65 = arith.constant 0 : index
    %c0_66 = arith.constant 0 : index
    %156 = vector.load %arg5[%c0_65, %c0_66] : memref<32x128xbf16, #tpu.memory_space<vmem>>, vector<32x128xbf16>
    %cst_67 = arith.constant dense<0.000000e+00> : vector<1x128xf32>
    %157 = tpu.matmul %153, %156, %cst_67 {dimension_numbers = #tpu.dot_dimension_numbers<[1], [0], [0], [1], [0, 0, 1, 1], [], []>} : vector<1x32xbf16>, vector<32x128xbf16>, vector<1x128xf32> -> vector<1x128xf32>
    %158 = arith.addf %155, %157 : vector<1x128xf32>
    %cst_68 = arith.constant dense<0xFF800000> : vector<1xf32>
    %159 = vector.multi_reduction <maximumf>, %158, %cst_68 [1] : vector<1x128xf32> to vector<1xf32>
    %160 = vector.shape_cast %159 : vector<1xf32> to vector<1x1xf32>
    %161 = vector.broadcast %160 : vector<1x1xf32> to vector<1x128xf32>
    %162 = arith.subf %158, %161 : vector<1x128xf32>
    %163 = math.exp %162 : vector<1x128xf32>
    %cst_69 = arith.constant dense<0.000000e+00> : vector<1xf32>
    %164 = vector.multi_reduction <add>, %163, %cst_69 [1] : vector<1x128xf32> to vector<1xf32>
    %165 = vector.shape_cast %164 : vector<1xf32> to vector<1x1xf32>
    %166 = vector.broadcast %165 : vector<1x1xf32> to vector<1x128xf32>
    %167 = arith.divf %163, %166 : vector<1x128xf32>
    %168 = arith.index_cast %c3_i32 : i32 to index
    %c0_70 = arith.constant 0 : index
    %169 = vector.load %arg9[%168, %c0_70] : memref<8x128xf32, #tpu.memory_space<vmem>>, vector<1x128xf32>
    tpu.vector_store %arg9[%168, %c0_70], %167 {strides = array<i32>} : memref<8x128xf32, #tpu.memory_space<vmem>>, vector<1x128xf32>,
    %170 = arith.truncf %167 : vector<1x128xf32> to vector<1x128xbf16>
    %c0_71 = arith.constant 0 : index
    %c0_72 = arith.constant 0 : index
    %171 = vector.load %arg2[%c0_71, %c0_72] : memref<128x32xbf16, #tpu.memory_space<vmem>>, vector<128x32xbf16>
    %cst_73 = arith.constant dense<0.000000e+00> : vector<1x32xf32>
    %172 = tpu.matmul %170, %171, %cst_73 {dimension_numbers = #tpu.dot_dimension_numbers<[1], [0], [0], [1], [0, 0, 1, 1], [], []>} : vector<1x128xbf16>, vector<128x32xbf16>, vector<1x32xf32> -> vector<1x32xf32>
    %173 = arith.index_cast %c3_i32 : i32 to index
    %c0_74 = arith.constant 0 : index
    %174 = vector.load %arg1[%173, %c0_74] : memref<8x32xf32, #tpu.memory_space<vmem>>, vector<1x32xf32>
    %175 = arith.truncf %172 : vector<1x32xf32> to vector<1x32xbf16>
    %c0_75 = arith.constant 0 : index
    %c0_76 = arith.constant 0 : index
    %176 = vector.load %arg6[%c0_75, %c0_76] : memref<32x32xbf16, #tpu.memory_space<vmem>>, vector<32x32xbf16>
    %cst_77 = arith.constant dense<0.000000e+00> : vector<1x32xf32>
    %177 = tpu.matmul %175, %176, %cst_77 {dimension_numbers = #tpu.dot_dimension_numbers<[1], [0], [0], [1], [0, 0, 1, 1], [], []>} : vector<1x32xbf16>, vector<32x32xbf16>, vector<1x32xf32> -> vector<1x32xf32>
    %178 = arith.addf %174, %177 : vector<1x32xf32>
    %cst_78 = arith.constant 0.000000e+00 : f32
    %179 = vector.broadcast %cst_78 : f32 to vector<1x32xf32>
    %180 = arith.maximumf %178, %179 : vector<1x32xf32>
    %181 = arith.truncf %180 : vector<1x32xf32> to vector<1x32xbf16>
    %182 = tpu.concatenate %181, %153 in 1 : vector<1x32xbf16>, vector<1x32xbf16> -> vector<1x64xbf16>
    %c0_79 = arith.constant 0 : index
    %c0_80 = arith.constant 0 : index
    %183 = vector.load %arg7[%c0_79, %c0_80] : memref<64x128xbf16, #tpu.memory_space<vmem>>, vector<64x128xbf16>
    %cst_81 = arith.constant dense<0.000000e+00> : vector<1x128xf32>
    %184 = tpu.matmul %182, %183, %cst_81 {dimension_numbers = #tpu.dot_dimension_numbers<[1], [0], [0], [1], [0, 0, 1, 1], [], []>} : vector<1x64xbf16>, vector<64x128xbf16>, vector<1x128xf32> -> vector<1x128xf32>
    %185 = arith.addf %184, %0 : vector<1x128xf32>
    %186 = arith.negf %185 : vector<1x128xf32>
    %187 = math.exp %186 : vector<1x128xf32>
    %cst_82 = arith.constant 1.000000e+00 : f32
    %188 = vector.broadcast %cst_82 : f32 to vector<1x128xf32>
    %189 = arith.addf %188, %187 : vector<1x128xf32>
    %190 = arith.divf %188, %189 : vector<1x128xf32>
    %191 = math.tanh %185 : vector<1x128xf32>
    %192 = vector.extract_strided_slice %190 {offsets = [0, 0], sizes = [1, 32], strides = [1, 1]} : vector<1x128xf32> to vector<1x32xf32>
    %193 = vector.extract_strided_slice %190 {offsets = [0, 32], sizes = [1, 32], strides = [1, 1]} : vector<1x128xf32> to vector<1x32xf32>
    %194 = vector.extract_strided_slice %191 {offsets = [0, 64], sizes = [1, 32], strides = [1, 1]} : vector<1x128xf32> to vector<1x32xf32>
    %195 = vector.extract_strided_slice %190 {offsets = [0, 96], sizes = [1, 32], strides = [1, 1]} : vector<1x128xf32> to vector<1x32xf32>
    %196 = arith.mulf %193, %148 : vector<1x32xf32>
    %197 = arith.mulf %192, %194 : vector<1x32xf32>
    %198 = arith.addf %196, %197 : vector<1x32xf32>
    %199 = math.tanh %198 : vector<1x32xf32>
    %200 = arith.mulf %195, %199 : vector<1x32xf32>
    %201 = arith.index_cast %c3_i32 : i32 to index
    %c0_83 = arith.constant 0 : index
    %202 = vector.load %arg10[%201, %c0_83] : memref<8x32xf32, #tpu.memory_space<vmem>>, vector<1x32xf32>
    tpu.vector_store %arg10[%201, %c0_83], %200 {strides = array<i32>} : memref<8x32xf32, #tpu.memory_space<vmem>>, vector<1x32xf32>,
    %c4_i32 = arith.constant 4 : i32
    %203 = arith.truncf %200 : vector<1x32xf32> to vector<1x32xbf16>
    %204 = arith.index_cast %c4_i32 : i32 to index
    %c0_84 = arith.constant 0 : index
    %205 = vector.load %arg0[%204, %c0_84] : memref<8x128xf32, #tpu.memory_space<vmem>>, vector<1x128xf32>
    %c0_85 = arith.constant 0 : index
    %c0_86 = arith.constant 0 : index
    %206 = vector.load %arg5[%c0_85, %c0_86] : memref<32x128xbf16, #tpu.memory_space<vmem>>, vector<32x128xbf16>
    %cst_87 = arith.constant dense<0.000000e+00> : vector<1x128xf32>
    %207 = tpu.matmul %203, %206, %cst_87 {dimension_numbers = #tpu.dot_dimension_numbers<[1], [0], [0], [1], [0, 0, 1, 1], [], []>} : vector<1x32xbf16>, vector<32x128xbf16>, vector<1x128xf32> -> vector<1x128xf32>
    %208 = arith.addf %205, %207 : vector<1x128xf32>
    %cst_88 = arith.constant dense<0xFF800000> : vector<1xf32>
    %209 = vector.multi_reduction <maximumf>, %208, %cst_88 [1] : vector<1x128xf32> to vector<1xf32>
    %210 = vector.shape_cast %209 : vector<1xf32> to vector<1x1xf32>
    %211 = vector.broadcast %210 : vector<1x1xf32> to vector<1x128xf32>
    %212 = arith.subf %208, %211 : vector<1x128xf32>
    %213 = math.exp %212 : vector<1x128xf32>
    %cst_89 = arith.constant dense<0.000000e+00> : vector<1xf32>
    %214 = vector.multi_reduction <add>, %213, %cst_89 [1] : vector<1x128xf32> to vector<1xf32>
    %215 = vector.shape_cast %214 : vector<1xf32> to vector<1x1xf32>
    %216 = vector.broadcast %215 : vector<1x1xf32> to vector<1x128xf32>
    %217 = arith.divf %213, %216 : vector<1x128xf32>
    %218 = arith.index_cast %c4_i32 : i32 to index
    %c0_90 = arith.constant 0 : index
    %219 = vector.load %arg9[%218, %c0_90] : memref<8x128xf32, #tpu.memory_space<vmem>>, vector<1x128xf32>
    tpu.vector_store %arg9[%218, %c0_90], %217 {strides = array<i32>} : memref<8x128xf32, #tpu.memory_space<vmem>>, vector<1x128xf32>,
    %220 = arith.truncf %217 : vector<1x128xf32> to vector<1x128xbf16>
    %c0_91 = arith.constant 0 : index
    %c0_92 = arith.constant 0 : index
    %221 = vector.load %arg2[%c0_91, %c0_92] : memref<128x32xbf16, #tpu.memory_space<vmem>>, vector<128x32xbf16>
    %cst_93 = arith.constant dense<0.000000e+00> : vector<1x32xf32>
    %222 = tpu.matmul %220, %221, %cst_93 {dimension_numbers = #tpu.dot_dimension_numbers<[1], [0], [0], [1], [0, 0, 1, 1], [], []>} : vector<1x128xbf16>, vector<128x32xbf16>, vector<1x32xf32> -> vector<1x32xf32>
    %223 = arith.index_cast %c4_i32 : i32 to index
    %c0_94 = arith.constant 0 : index
    %224 = vector.load %arg1[%223, %c0_94] : memref<8x32xf32, #tpu.memory_space<vmem>>, vector<1x32xf32>
    %225 = arith.truncf %222 : vector<1x32xf32> to vector<1x32xbf16>
    %c0_95 = arith.constant 0 : index
    %c0_96 = arith.constant 0 : index
    %226 = vector.load %arg6[%c0_95, %c0_96] : memref<32x32xbf16, #tpu.memory_space<vmem>>, vector<32x32xbf16>
    %cst_97 = arith.constant dense<0.000000e+00> : vector<1x32xf32>
    %227 = tpu.matmul %225, %226, %cst_97 {dimension_numbers = #tpu.dot_dimension_numbers<[1], [0], [0], [1], [0, 0, 1, 1], [], []>} : vector<1x32xbf16>, vector<32x32xbf16>, vector<1x32xf32> -> vector<1x32xf32>
    %228 = arith.addf %224, %227 : vector<1x32xf32>
    %cst_98 = arith.constant 0.000000e+00 : f32
    %229 = vector.broadcast %cst_98 : f32 to vector<1x32xf32>
    %230 = arith.maximumf %228, %229 : vector<1x32xf32>
    %231 = arith.truncf %230 : vector<1x32xf32> to vector<1x32xbf16>
    %232 = tpu.concatenate %231, %203 in 1 : vector<1x32xbf16>, vector<1x32xbf16> -> vector<1x64xbf16>
    %c0_99 = arith.constant 0 : index
    %c0_100 = arith.constant 0 : index
    %233 = vector.load %arg7[%c0_99, %c0_100] : memref<64x128xbf16, #tpu.memory_space<vmem>>, vector<64x128xbf16>
    %cst_101 = arith.constant dense<0.000000e+00> : vector<1x128xf32>
    %234 = tpu.matmul %232, %233, %cst_101 {dimension_numbers = #tpu.dot_dimension_numbers<[1], [0], [0], [1], [0, 0, 1, 1], [], []>} : vector<1x64xbf16>, vector<64x128xbf16>, vector<1x128xf32> -> vector<1x128xf32>
    %235 = arith.addf %234, %0 : vector<1x128xf32>
    %236 = arith.negf %235 : vector<1x128xf32>
    %237 = math.exp %236 : vector<1x128xf32>
    %cst_102 = arith.constant 1.000000e+00 : f32
    %238 = vector.broadcast %cst_102 : f32 to vector<1x128xf32>
    %239 = arith.addf %238, %237 : vector<1x128xf32>
    %240 = arith.divf %238, %239 : vector<1x128xf32>
    %241 = math.tanh %235 : vector<1x128xf32>
    %242 = vector.extract_strided_slice %240 {offsets = [0, 0], sizes = [1, 32], strides = [1, 1]} : vector<1x128xf32> to vector<1x32xf32>
    %243 = vector.extract_strided_slice %240 {offsets = [0, 32], sizes = [1, 32], strides = [1, 1]} : vector<1x128xf32> to vector<1x32xf32>
    %244 = vector.extract_strided_slice %241 {offsets = [0, 64], sizes = [1, 32], strides = [1, 1]} : vector<1x128xf32> to vector<1x32xf32>
    %245 = vector.extract_strided_slice %240 {offsets = [0, 96], sizes = [1, 32], strides = [1, 1]} : vector<1x128xf32> to vector<1x32xf32>
    %246 = arith.mulf %243, %198 : vector<1x32xf32>
    %247 = arith.mulf %242, %244 : vector<1x32xf32>
    %248 = arith.addf %246, %247 : vector<1x32xf32>
    %249 = math.tanh %248 : vector<1x32xf32>
    %250 = arith.mulf %245, %249 : vector<1x32xf32>
    %251 = arith.index_cast %c4_i32 : i32 to index
    %c0_103 = arith.constant 0 : index
    %252 = vector.load %arg10[%251, %c0_103] : memref<8x32xf32, #tpu.memory_space<vmem>>, vector<1x32xf32>
    tpu.vector_store %arg10[%251, %c0_103], %250 {strides = array<i32>} : memref<8x32xf32, #tpu.memory_space<vmem>>, vector<1x32xf32>,
    %c5_i32 = arith.constant 5 : i32
    %253 = arith.truncf %250 : vector<1x32xf32> to vector<1x32xbf16>
    %254 = arith.index_cast %c5_i32 : i32 to index
    %c0_104 = arith.constant 0 : index
    %255 = vector.load %arg0[%254, %c0_104] : memref<8x128xf32, #tpu.memory_space<vmem>>, vector<1x128xf32>
    %c0_105 = arith.constant 0 : index
    %c0_106 = arith.constant 0 : index
    %256 = vector.load %arg5[%c0_105, %c0_106] : memref<32x128xbf16, #tpu.memory_space<vmem>>, vector<32x128xbf16>
    %cst_107 = arith.constant dense<0.000000e+00> : vector<1x128xf32>
    %257 = tpu.matmul %253, %256, %cst_107 {dimension_numbers = #tpu.dot_dimension_numbers<[1], [0], [0], [1], [0, 0, 1, 1], [], []>} : vector<1x32xbf16>, vector<32x128xbf16>, vector<1x128xf32> -> vector<1x128xf32>
    %258 = arith.addf %255, %257 : vector<1x128xf32>
    %cst_108 = arith.constant dense<0xFF800000> : vector<1xf32>
    %259 = vector.multi_reduction <maximumf>, %258, %cst_108 [1] : vector<1x128xf32> to vector<1xf32>
    %260 = vector.shape_cast %259 : vector<1xf32> to vector<1x1xf32>
    %261 = vector.broadcast %260 : vector<1x1xf32> to vector<1x128xf32>
    %262 = arith.subf %258, %261 : vector<1x128xf32>
    %263 = math.exp %262 : vector<1x128xf32>
    %cst_109 = arith.constant dense<0.000000e+00> : vector<1xf32>
    %264 = vector.multi_reduction <add>, %263, %cst_109 [1] : vector<1x128xf32> to vector<1xf32>
    %265 = vector.shape_cast %264 : vector<1xf32> to vector<1x1xf32>
    %266 = vector.broadcast %265 : vector<1x1xf32> to vector<1x128xf32>
    %267 = arith.divf %263, %266 : vector<1x128xf32>
    %268 = arith.index_cast %c5_i32 : i32 to index
    %c0_110 = arith.constant 0 : index
    %269 = vector.load %arg9[%268, %c0_110] : memref<8x128xf32, #tpu.memory_space<vmem>>, vector<1x128xf32>
    tpu.vector_store %arg9[%268, %c0_110], %267 {strides = array<i32>} : memref<8x128xf32, #tpu.memory_space<vmem>>, vector<1x128xf32>,
    %270 = arith.truncf %267 : vector<1x128xf32> to vector<1x128xbf16>
    %c0_111 = arith.constant 0 : index
    %c0_112 = arith.constant 0 : index
    %271 = vector.load %arg2[%c0_111, %c0_112] : memref<128x32xbf16, #tpu.memory_space<vmem>>, vector<128x32xbf16>
    %cst_113 = arith.constant dense<0.000000e+00> : vector<1x32xf32>
    %272 = tpu.matmul %270, %271, %cst_113 {dimension_numbers = #tpu.dot_dimension_numbers<[1], [0], [0], [1], [0, 0, 1, 1], [], []>} : vector<1x128xbf16>, vector<128x32xbf16>, vector<1x32xf32> -> vector<1x32xf32>
    %273 = arith.index_cast %c5_i32 : i32 to index
    %c0_114 = arith.constant 0 : index
    %274 = vector.load %arg1[%273, %c0_114] : memref<8x32xf32, #tpu.memory_space<vmem>>, vector<1x32xf32>
    %275 = arith.truncf %272 : vector<1x32xf32> to vector<1x32xbf16>
    %c0_115 = arith.constant 0 : index
    %c0_116 = arith.constant 0 : index
    %276 = vector.load %arg6[%c0_115, %c0_116] : memref<32x32xbf16, #tpu.memory_space<vmem>>, vector<32x32xbf16>
    %cst_117 = arith.constant dense<0.000000e+00> : vector<1x32xf32>
    %277 = tpu.matmul %275, %276, %cst_117 {dimension_numbers = #tpu.dot_dimension_numbers<[1], [0], [0], [1], [0, 0, 1, 1], [], []>} : vector<1x32xbf16>, vector<32x32xbf16>, vector<1x32xf32> -> vector<1x32xf32>
    %278 = arith.addf %274, %277 : vector<1x32xf32>
    %cst_118 = arith.constant 0.000000e+00 : f32
    %279 = vector.broadcast %cst_118 : f32 to vector<1x32xf32>
    %280 = arith.maximumf %278, %279 : vector<1x32xf32>
    %281 = arith.truncf %280 : vector<1x32xf32> to vector<1x32xbf16>
    %282 = tpu.concatenate %281, %253 in 1 : vector<1x32xbf16>, vector<1x32xbf16> -> vector<1x64xbf16>
    %c0_119 = arith.constant 0 : index
    %c0_120 = arith.constant 0 : index
    %283 = vector.load %arg7[%c0_119, %c0_120] : memref<64x128xbf16, #tpu.memory_space<vmem>>, vector<64x128xbf16>
    %cst_121 = arith.constant dense<0.000000e+00> : vector<1x128xf32>
    %284 = tpu.matmul %282, %283, %cst_121 {dimension_numbers = #tpu.dot_dimension_numbers<[1], [0], [0], [1], [0, 0, 1, 1], [], []>} : vector<1x64xbf16>, vector<64x128xbf16>, vector<1x128xf32> -> vector<1x128xf32>
    %285 = arith.addf %284, %0 : vector<1x128xf32>
    %286 = arith.negf %285 : vector<1x128xf32>
    %287 = math.exp %286 : vector<1x128xf32>
    %cst_122 = arith.constant 1.000000e+00 : f32
    %288 = vector.broadcast %cst_122 : f32 to vector<1x128xf32>
    %289 = arith.addf %288, %287 : vector<1x128xf32>
    %290 = arith.divf %288, %289 : vector<1x128xf32>
    %291 = math.tanh %285 : vector<1x128xf32>
    %292 = vector.extract_strided_slice %290 {offsets = [0, 0], sizes = [1, 32], strides = [1, 1]} : vector<1x128xf32> to vector<1x32xf32>
    %293 = vector.extract_strided_slice %290 {offsets = [0, 32], sizes = [1, 32], strides = [1, 1]} : vector<1x128xf32> to vector<1x32xf32>
    %294 = vector.extract_strided_slice %291 {offsets = [0, 64], sizes = [1, 32], strides = [1, 1]} : vector<1x128xf32> to vector<1x32xf32>
    %295 = vector.extract_strided_slice %290 {offsets = [0, 96], sizes = [1, 32], strides = [1, 1]} : vector<1x128xf32> to vector<1x32xf32>
    %296 = arith.mulf %293, %248 : vector<1x32xf32>
    %297 = arith.mulf %292, %294 : vector<1x32xf32>
    %298 = arith.addf %296, %297 : vector<1x32xf32>
    %299 = math.tanh %298 : vector<1x32xf32>
    %300 = arith.mulf %295, %299 : vector<1x32xf32>
    %301 = arith.index_cast %c5_i32 : i32 to index
    %c0_123 = arith.constant 0 : index
    %302 = vector.load %arg10[%301, %c0_123] : memref<8x32xf32, #tpu.memory_space<vmem>>, vector<1x32xf32>
    tpu.vector_store %arg10[%301, %c0_123], %300 {strides = array<i32>} : memref<8x32xf32, #tpu.memory_space<vmem>>, vector<1x32xf32>,
    %c6_i32 = arith.constant 6 : i32
    %303 = arith.truncf %300 : vector<1x32xf32> to vector<1x32xbf16>
    %304 = arith.index_cast %c6_i32 : i32 to index
    %c0_124 = arith.constant 0 : index
    %305 = vector.load %arg0[%304, %c0_124] : memref<8x128xf32, #tpu.memory_space<vmem>>, vector<1x128xf32>
    %c0_125 = arith.constant 0 : index
    %c0_126 = arith.constant 0 : index
    %306 = vector.load %arg5[%c0_125, %c0_126] : memref<32x128xbf16, #tpu.memory_space<vmem>>, vector<32x128xbf16>
    %cst_127 = arith.constant dense<0.000000e+00> : vector<1x128xf32>
    %307 = tpu.matmul %303, %306, %cst_127 {dimension_numbers = #tpu.dot_dimension_numbers<[1], [0], [0], [1], [0, 0, 1, 1], [], []>} : vector<1x32xbf16>, vector<32x128xbf16>, vector<1x128xf32> -> vector<1x128xf32>
    %308 = arith.addf %305, %307 : vector<1x128xf32>
    %cst_128 = arith.constant dense<0xFF800000> : vector<1xf32>
    %309 = vector.multi_reduction <maximumf>, %308, %cst_128 [1] : vector<1x128xf32> to vector<1xf32>
    %310 = vector.shape_cast %309 : vector<1xf32> to vector<1x1xf32>
    %311 = vector.broadcast %310 : vector<1x1xf32> to vector<1x128xf32>
    %312 = arith.subf %308, %311 : vector<1x128xf32>
    %313 = math.exp %312 : vector<1x128xf32>
    %cst_129 = arith.constant dense<0.000000e+00> : vector<1xf32>
    %314 = vector.multi_reduction <add>, %313, %cst_129 [1] : vector<1x128xf32> to vector<1xf32>
    %315 = vector.shape_cast %314 : vector<1xf32> to vector<1x1xf32>
    %316 = vector.broadcast %315 : vector<1x1xf32> to vector<1x128xf32>
    %317 = arith.divf %313, %316 : vector<1x128xf32>
    %318 = arith.index_cast %c6_i32 : i32 to index
    %c0_130 = arith.constant 0 : index
    %319 = vector.load %arg9[%318, %c0_130] : memref<8x128xf32, #tpu.memory_space<vmem>>, vector<1x128xf32>
    tpu.vector_store %arg9[%318, %c0_130], %317 {strides = array<i32>} : memref<8x128xf32, #tpu.memory_space<vmem>>, vector<1x128xf32>,
    %320 = arith.truncf %317 : vector<1x128xf32> to vector<1x128xbf16>
    %c0_131 = arith.constant 0 : index
    %c0_132 = arith.constant 0 : index
    %321 = vector.load %arg2[%c0_131, %c0_132] : memref<128x32xbf16, #tpu.memory_space<vmem>>, vector<128x32xbf16>
    %cst_133 = arith.constant dense<0.000000e+00> : vector<1x32xf32>
    %322 = tpu.matmul %320, %321, %cst_133 {dimension_numbers = #tpu.dot_dimension_numbers<[1], [0], [0], [1], [0, 0, 1, 1], [], []>} : vector<1x128xbf16>, vector<128x32xbf16>, vector<1x32xf32> -> vector<1x32xf32>
    %323 = arith.index_cast %c6_i32 : i32 to index
    %c0_134 = arith.constant 0 : index
    %324 = vector.load %arg1[%323, %c0_134] : memref<8x32xf32, #tpu.memory_space<vmem>>, vector<1x32xf32>
    %325 = arith.truncf %322 : vector<1x32xf32> to vector<1x32xbf16>
    %c0_135 = arith.constant 0 : index
    %c0_136 = arith.constant 0 : index
    %326 = vector.load %arg6[%c0_135, %c0_136] : memref<32x32xbf16, #tpu.memory_space<vmem>>, vector<32x32xbf16>
    %cst_137 = arith.constant dense<0.000000e+00> : vector<1x32xf32>
    %327 = tpu.matmul %325, %326, %cst_137 {dimension_numbers = #tpu.dot_dimension_numbers<[1], [0], [0], [1], [0, 0, 1, 1], [], []>} : vector<1x32xbf16>, vector<32x32xbf16>, vector<1x32xf32> -> vector<1x32xf32>
    %328 = arith.addf %324, %327 : vector<1x32xf32>
    %cst_138 = arith.constant 0.000000e+00 : f32
    %329 = vector.broadcast %cst_138 : f32 to vector<1x32xf32>
    %330 = arith.maximumf %328, %329 : vector<1x32xf32>
    %331 = arith.truncf %330 : vector<1x32xf32> to vector<1x32xbf16>
    %332 = tpu.concatenate %331, %303 in 1 : vector<1x32xbf16>, vector<1x32xbf16> -> vector<1x64xbf16>
    %c0_139 = arith.constant 0 : index
    %c0_140 = arith.constant 0 : index
    %333 = vector.load %arg7[%c0_139, %c0_140] : memref<64x128xbf16, #tpu.memory_space<vmem>>, vector<64x128xbf16>
    %cst_141 = arith.constant dense<0.000000e+00> : vector<1x128xf32>
    %334 = tpu.matmul %332, %333, %cst_141 {dimension_numbers = #tpu.dot_dimension_numbers<[1], [0], [0], [1], [0, 0, 1, 1], [], []>} : vector<1x64xbf16>, vector<64x128xbf16>, vector<1x128xf32> -> vector<1x128xf32>
    %335 = arith.addf %334, %0 : vector<1x128xf32>
    %336 = arith.negf %335 : vector<1x128xf32>
    %337 = math.exp %336 : vector<1x128xf32>
    %cst_142 = arith.constant 1.000000e+00 : f32
    %338 = vector.broadcast %cst_142 : f32 to vector<1x128xf32>
    %339 = arith.addf %338, %337 : vector<1x128xf32>
    %340 = arith.divf %338, %339 : vector<1x128xf32>
    %341 = math.tanh %335 : vector<1x128xf32>
    %342 = vector.extract_strided_slice %340 {offsets = [0, 0], sizes = [1, 32], strides = [1, 1]} : vector<1x128xf32> to vector<1x32xf32>
    %343 = vector.extract_strided_slice %340 {offsets = [0, 32], sizes = [1, 32], strides = [1, 1]} : vector<1x128xf32> to vector<1x32xf32>
    %344 = vector.extract_strided_slice %341 {offsets = [0, 64], sizes = [1, 32], strides = [1, 1]} : vector<1x128xf32> to vector<1x32xf32>
    %345 = vector.extract_strided_slice %340 {offsets = [0, 96], sizes = [1, 32], strides = [1, 1]} : vector<1x128xf32> to vector<1x32xf32>
    %346 = arith.mulf %343, %298 : vector<1x32xf32>
    %347 = arith.mulf %342, %344 : vector<1x32xf32>
    %348 = arith.addf %346, %347 : vector<1x32xf32>
    %349 = math.tanh %348 : vector<1x32xf32>
    %350 = arith.mulf %345, %349 : vector<1x32xf32>
    %351 = arith.index_cast %c6_i32 : i32 to index
    %c0_143 = arith.constant 0 : index
    %352 = vector.load %arg10[%351, %c0_143] : memref<8x32xf32, #tpu.memory_space<vmem>>, vector<1x32xf32>
    tpu.vector_store %arg10[%351, %c0_143], %350 {strides = array<i32>} : memref<8x32xf32, #tpu.memory_space<vmem>>, vector<1x32xf32>,
    %c7_i32 = arith.constant 7 : i32
    %353 = arith.truncf %350 : vector<1x32xf32> to vector<1x32xbf16>
    %354 = arith.index_cast %c7_i32 : i32 to index
    %c0_144 = arith.constant 0 : index
    %355 = vector.load %arg0[%354, %c0_144] : memref<8x128xf32, #tpu.memory_space<vmem>>, vector<1x128xf32>
    %c0_145 = arith.constant 0 : index
    %c0_146 = arith.constant 0 : index
    %356 = vector.load %arg5[%c0_145, %c0_146] : memref<32x128xbf16, #tpu.memory_space<vmem>>, vector<32x128xbf16>
    %cst_147 = arith.constant dense<0.000000e+00> : vector<1x128xf32>
    %357 = tpu.matmul %353, %356, %cst_147 {dimension_numbers = #tpu.dot_dimension_numbers<[1], [0], [0], [1], [0, 0, 1, 1], [], []>} : vector<1x32xbf16>, vector<32x128xbf16>, vector<1x128xf32> -> vector<1x128xf32>
    %358 = arith.addf %355, %357 : vector<1x128xf32>
    %cst_148 = arith.constant dense<0xFF800000> : vector<1xf32>
    %359 = vector.multi_reduction <maximumf>, %358, %cst_148 [1] : vector<1x128xf32> to vector<1xf32>
    %360 = vector.shape_cast %359 : vector<1xf32> to vector<1x1xf32>
    %361 = vector.broadcast %360 : vector<1x1xf32> to vector<1x128xf32>
    %362 = arith.subf %358, %361 : vector<1x128xf32>
    %363 = math.exp %362 : vector<1x128xf32>
    %cst_149 = arith.constant dense<0.000000e+00> : vector<1xf32>
    %364 = vector.multi_reduction <add>, %363, %cst_149 [1] : vector<1x128xf32> to vector<1xf32>
    %365 = vector.shape_cast %364 : vector<1xf32> to vector<1x1xf32>
    %366 = vector.broadcast %365 : vector<1x1xf32> to vector<1x128xf32>
    %367 = arith.divf %363, %366 : vector<1x128xf32>
    %368 = arith.index_cast %c7_i32 : i32 to index
    %c0_150 = arith.constant 0 : index
    %369 = vector.load %arg9[%368, %c0_150] : memref<8x128xf32, #tpu.memory_space<vmem>>, vector<1x128xf32>
    tpu.vector_store %arg9[%368, %c0_150], %367 {strides = array<i32>} : memref<8x128xf32, #tpu.memory_space<vmem>>, vector<1x128xf32>,
    %370 = arith.truncf %367 : vector<1x128xf32> to vector<1x128xbf16>
    %c0_151 = arith.constant 0 : index
    %c0_152 = arith.constant 0 : index
    %371 = vector.load %arg2[%c0_151, %c0_152] : memref<128x32xbf16, #tpu.memory_space<vmem>>, vector<128x32xbf16>
    %cst_153 = arith.constant dense<0.000000e+00> : vector<1x32xf32>
    %372 = tpu.matmul %370, %371, %cst_153 {dimension_numbers = #tpu.dot_dimension_numbers<[1], [0], [0], [1], [0, 0, 1, 1], [], []>} : vector<1x128xbf16>, vector<128x32xbf16>, vector<1x32xf32> -> vector<1x32xf32>
    %373 = arith.index_cast %c7_i32 : i32 to index
    %c0_154 = arith.constant 0 : index
    %374 = vector.load %arg1[%373, %c0_154] : memref<8x32xf32, #tpu.memory_space<vmem>>, vector<1x32xf32>
    %375 = arith.truncf %372 : vector<1x32xf32> to vector<1x32xbf16>
    %c0_155 = arith.constant 0 : index
    %c0_156 = arith.constant 0 : index
    %376 = vector.load %arg6[%c0_155, %c0_156] : memref<32x32xbf16, #tpu.memory_space<vmem>>, vector<32x32xbf16>
    %cst_157 = arith.constant dense<0.000000e+00> : vector<1x32xf32>
    %377 = tpu.matmul %375, %376, %cst_157 {dimension_numbers = #tpu.dot_dimension_numbers<[1], [0], [0], [1], [0, 0, 1, 1], [], []>} : vector<1x32xbf16>, vector<32x32xbf16>, vector<1x32xf32> -> vector<1x32xf32>
    %378 = arith.addf %374, %377 : vector<1x32xf32>
    %cst_158 = arith.constant 0.000000e+00 : f32
    %379 = vector.broadcast %cst_158 : f32 to vector<1x32xf32>
    %380 = arith.maximumf %378, %379 : vector<1x32xf32>
    %381 = arith.truncf %380 : vector<1x32xf32> to vector<1x32xbf16>
    %382 = tpu.concatenate %381, %353 in 1 : vector<1x32xbf16>, vector<1x32xbf16> -> vector<1x64xbf16>
    %c0_159 = arith.constant 0 : index
    %c0_160 = arith.constant 0 : index
    %383 = vector.load %arg7[%c0_159, %c0_160] : memref<64x128xbf16, #tpu.memory_space<vmem>>, vector<64x128xbf16>
    %cst_161 = arith.constant dense<0.000000e+00> : vector<1x128xf32>
    %384 = tpu.matmul %382, %383, %cst_161 {dimension_numbers = #tpu.dot_dimension_numbers<[1], [0], [0], [1], [0, 0, 1, 1], [], []>} : vector<1x64xbf16>, vector<64x128xbf16>, vector<1x128xf32> -> vector<1x128xf32>
    %385 = arith.addf %384, %0 : vector<1x128xf32>
    %386 = arith.negf %385 : vector<1x128xf32>
    %387 = math.exp %386 : vector<1x128xf32>
    %cst_162 = arith.constant 1.000000e+00 : f32
    %388 = vector.broadcast %cst_162 : f32 to vector<1x128xf32>
    %389 = arith.addf %388, %387 : vector<1x128xf32>
    %390 = arith.divf %388, %389 : vector<1x128xf32>
    %391 = math.tanh %385 : vector<1x128xf32>
    %392 = vector.extract_strided_slice %390 {offsets = [0, 0], sizes = [1, 32], strides = [1, 1]} : vector<1x128xf32> to vector<1x32xf32>
    %393 = vector.extract_strided_slice %390 {offsets = [0, 32], sizes = [1, 32], strides = [1, 1]} : vector<1x128xf32> to vector<1x32xf32>
    %394 = vector.extract_strided_slice %391 {offsets = [0, 64], sizes = [1, 32], strides = [1, 1]} : vector<1x128xf32> to vector<1x32xf32>
    %395 = vector.extract_strided_slice %390 {offsets = [0, 96], sizes = [1, 32], strides = [1, 1]} : vector<1x128xf32> to vector<1x32xf32>
    %396 = arith.mulf %393, %348 : vector<1x32xf32>
    %397 = arith.mulf %392, %394 : vector<1x32xf32>
    %398 = arith.addf %396, %397 : vector<1x32xf32>
    %399 = math.tanh %398 : vector<1x32xf32>
    %400 = arith.mulf %395, %399 : vector<1x32xf32>
    %401 = arith.index_cast %c7_i32 : i32 to index
    %c0_163 = arith.constant 0 : index
    %402 = vector.load %arg10[%401, %c0_163] : memref<8x32xf32, #tpu.memory_space<vmem>>, vector<1x32xf32>
    tpu.vector_store %arg10[%401, %c0_163], %400 {strides = array<i32>} : memref<8x32xf32, #tpu.memory_space<vmem>>, vector<1x32xf32>,
    %c8_i32 = arith.constant 8 : i32
    %c0_164 = arith.constant 0 : index
    %c0_165 = arith.constant 0 : index
    %403 = vector.load %arg11[%c0_164, %c0_165] : memref<1x32xf32, #tpu.memory_space<vmem>>, vector<1x32xf32>
    tpu.vector_store %arg11[%c0_164, %c0_165], %398 {strides = array<i32>} : memref<1x32xf32, #tpu.memory_space<vmem>>, vector<1x32xf32>,
    return
  }
}

</mosaic_0001>

<bundles_post_ra>
// kernel: _forward_seq.1
= control target key start
LH: loop header
LB: loop body
LE: loop exit
PB: predicated region body
PF: predicated region fallthrough
CT: control target
= control target key end

     0   :  { %17 = vsyncpa [#allocation3], 0  ;;  %v3901_v1 = vmov 0.0   ;;  %vm3902_vm0 = vmmov 0   ;;  %vm59_vm1 = vcmask 261120   ;;  %s4814_s0 = inlined_call_operand.vmem [shape: f32[8,128], index: 0, kind: input, shape index: {}]   ;;  %s4815_s1 = inlined_call_operand.vmem [shape: f32[8,32], index: 1, kind: input, shape index: {}]   ;;  %s4816_s2 = inlined_call_operand.vmem [shape: bf16[128,32], index: 2, kind: input, shape index: {}]   ;;  %s4817_s3 = inlined_call_operand.vmem [shape: f32[1,32], index: 3, kind: input, shape index: {}]   ;;  %s4818_s4 = inlined_call_operand.vmem [shape: f32[1,32], index: 4, kind: input, shape index: {}]   ;;  %s4819_s5 = inlined_call_operand.vmem [shape: bf16[32,128], index: 5, kind: input, shape index: {}]   ;;  %s4820_s6 = inlined_call_operand.vmem [shape: bf16[32,32], index: 6, kind: input, shape index: {}]   ;;  %s4821_s7 = inlined_call_operand.vmem [shape: bf16[64,128], index: 7, kind: input, shape index: {}]   ;;  %s4822_s8 = inlined_call_operand.vmem [shape: f32[1,128], index: 8, kind: input, shape index: {}]   ;;  %s4823_s9 = inlined_call_operand.hbm [shape: f32[8,128], index: 9, kind: output, shape index: {0}]   ;;  %s4824_s10 = inlined_call_operand.vmem [shape: f32[8,32], index: 10, kind: output, shape index: {1}]   ;;  %s4825_s11 = inlined_call_operand.hbm [shape: f32[1,32], index: 11, kind: output, shape index: {2}]  }
   0x1   :  { %v3632_v0 = vld [vmem:[%s4819_s5 + $0x8] sm:$0xff]   ;;  %3241 = vmatprep.subr.bf16.mxu0 %v3901_v1  ;;  %3249 = vmatprep.subr.bf16.mxu1 %v3901_v1  ;;  %v3633_v2 = vld [vmem:[%s4819_s5] sm:$0xff]  }
   0x2   :  { %3242 = vmatpush3.bf16.msra.mxu0 %v3632_v0  ;;  %3245 = vmatprep.mubr.msk.bf16.mxu0 %vm3902_vm0, %v3901_v1  ;;  %v39_v3 = vld [vmem:[%s4817_s3] sm:$0x1] }
   0x3   :  { %3243 = vmatprep.subr.bf16.mxu0 %v3901_v1  ;;  %3265 = vmatprep.mubr.msk.bf16.mxu1 %vm3902_vm0, %v3901_v1  ;;  %v41_v4 = vpack.c.bf16 %v39_v3, %v39_v3 }
   0x6   :  { %3244 = vmatpush3.bf16.msra.mxu0 %v3633_v2 }
   0x7   :  { %3269 = vmatprep.subr.bf16.mxu0 %v3901_v1 }
   0x9   :  { %3246 = vmatmul.mubr.msk.bf16.vlgmr.msra.gmra.mxu0 %vm59_vm1, %v41_v4 }
   0xa   :  { %3273 = vmatprep.mubr.msk.bf16.mxu0 %vm3902_vm0, %v3901_v1 }
   0xb   :  { %18 = vsyncpa [#allocation5], 0  ;;  %v42_v5 = vld [vmem:[%s4814_s0] sm:$0x1]  ;;  %vm104_vm2 = vcmask 1040384   ;;  %v3634_v12 = vld [vmem:[%s4816_s2 + $0x38] sm:$0xff]  }
   0xc   :  { %3250 = vmatpush3.bf16.msra.mxu1 %v3634_v12  ;;  %v3635_v13 = vld [vmem:[%s4816_s2 + $0x30] sm:$0xff]   ;;  %v3636_v14 = vld [vmem:[%s4816_s2 + $0x28] sm:$0xff]   ;;  %v3637_v15 = vld [vmem:[%s4816_s2 + $0x20] sm:$0xff]   ;;  %s3903_s3 = smov 32   ;;  %vm324_vm3 = vcmask 523264   ;;  %s3904_s19 = smov 64  }
   0xd   :  { %3251 = vmatprep.subr.bf16.mxu1 %v3901_v1  ;;  %v3638_v21 = vld [vmem:[%s4816_s2 + $0x18] sm:$0xff]   ;;  %v3639_v22 = vld [vmem:[%s4816_s2 + $0x10] sm:$0xff]   ;;  %v3640_v23 = vld [vmem:[%s4816_s2 + $0x8] sm:$0xff]   ;;  %287 = vrot.lane.b32.xlu1 %v41_v4, %s3903_s3  ;;  %vm403_vm4 = vcmask 253952  }
   0xe   :  { %v3641_v24 = vld [vmem:[%s4816_s2] sm:$0xff]   ;;  %v3642_v25 = vld [vmem:[%s4820_s6 + $0x8] sm:$0xff]   ;;  %v3644_v32 = vld [vmem:[%s4821_s7 + $0x18] sm:$0xff]  }
   0xf   :  { %3270 = vmatpush3.bf16.msra.mxu0 %v3642_v25  ;;  %v3643_v26 = vld [vmem:[%s4820_s6] sm:$0xff]   ;;  %v3645_v36 = vld [vmem:[%s4821_s7 + $0x10] sm:$0xff]   ;;  %v3646_v38 = vld [vmem:[%s4821_s7 + $0x8] sm:$0xff]  }
  0x10   :  { %3252 = vmatpush3.bf16.msra.mxu1 %v3635_v13  ;;  %3271 = vmatprep.subr.bf16.mxu0 %v3901_v1  ;;  %v3647_v39 = vld [vmem:[%s4821_s7] sm:$0xff]  }
  0x11   :  { %3253 = vmatprep.subr.bf16.mxu1 %v3901_v1  ;;  %v2940_v40 = vld [vmem:[%s4818_s4] ss:$0 sm:$0xff]  ;;  %v406_v12 = vld [vmem:[%s4814_s0 + $0x1] sm:$0x1]  ;;  %s3907_s4 = smov [#allocation4]  }
  0x12   :  { %v222_v41 = vld [vmem:[%s4815_s1] sm:$0x1] }
  0x13   :  { %3272 = vmatpush3.bf16.msra.mxu0 %v3643_v26  ;;  %v4069_v51 = vld [vmem:[%s4822_s8] sm:$0x1] }
  0x14   :  { %3254 = vmatpush3.bf16.msra.mxu1 %v3636_v14  ;;  %3277 = vmatprep.subr.bf16.mxu0 %v3901_v1 }
  0x15   :  { %3255 = vmatprep.subr.bf16.mxu1 %v3901_v1 }
  0x18   :  { %3256 = vmatpush3.bf16.msra.mxu1 %v3637_v15 }
  0x19   :  { %3257 = vmatprep.subr.bf16.mxu1 %v3901_v1 }
  0x1c   :  { %3258 = vmatpush3.bf16.msra.mxu1 %v3638_v21  ;;  %v3652_v21 = vld [vmem:[%s4816_s2 + $0x28] sm:$0xff]  }
  0x1d   :  { %3259 = vmatprep.subr.bf16.mxu1 %v3901_v1 }
  0x20   :  { %3260 = vmatpush3.bf16.msra.mxu1 %v3639_v22  ;;  %v3653_v22 = vld [vmem:[%s4816_s2 + $0x20] sm:$0xff]  }
  0x21   :  { %3261 = vmatprep.subr.bf16.mxu1 %v3901_v1 }
  0x24   :  { %3262 = vmatpush3.bf16.msra.mxu1 %v3640_v23 }
  0x25   :  { %3263 = vmatprep.subr.bf16.mxu1 %v3901_v1 }
  0x28   :  { %3264 = vmatpush3.bf16.msra.mxu1 %v3641_v24 }
  0x29   :  { %3297 = vmatprep.subr.bf16.mxu1 %v3901_v1 }
  0x7f   :  { %v288_v47 = vpop.permute.xlu1 %287 }
  0xc9   :  { %v97_v6 = vpop.f32.mrf.mxu0 }
  0xca   :  { %v103_v7 = vadd.f32 %v97_v6, %v42_v5  ;;  %v3648_v5 = vld [vmem:[%s4819_s5 + $0x8] sm:$0xff]   ;;  %v3649_v6 = vld [vmem:[%s4819_s5] sm:$0xff]  }
  0xcb   :  { %v3247_v8 = vpop.f32.mrf.mxu0 }
  0xcc   :  { %v105_v9 = vsel %vm104_vm2, %v103_v7, -inf }
  0xcd   :  { %106 = vmax.xlane.f32.xlu0 %v105_v9  ;;  %v100_v10 = vpop.f32.mrf.mxu0 }
  0xcf   :  { %v3248_v11 = vpop.f32.mrf.mxu0 }
 0x156   :  { %v107_v16 = vpop.xlane.xlu0 %106 }
 0x157   :  { %v108_v17 = vsub.f32 %v103_v7, %v107_v16 }
 0x159   :  { %v109_v18 = vmul.f32 1.442695, %v108_v17 }
 0x15b   :  { %3760 = vpow2.f32 %v109_v18 }
 0x168   :  { %v3761_v19 = vpop.eup %3760 }
 0x169   :  { %v111_v20 = vsel %vm104_vm2, %v3761_v19, 0.0 }
 0x16a   :  { %112 = vadd.xlane.f32.xlu0 %v111_v20  ;;  %v3651_v20 = vld [vmem:[%s4816_s2 + $0x30] sm:$0xff]  }
 0x180   :  { %379 = vrot.lane.b32.xlu0 %v2940_v40, %s3903_s3 }
 0x1f3   :  { %v113_v27 = vpop.xlane.xlu0 %112 }
 0x1f4   :  { %3762 = vrcp.f32 %v113_v27 }
 0x1f7   :  { %v380_v0 = vpop.permute.xlu0 %379 }
 0x201   :  { %v3763_v28 = vpop.eup %3762 }
 0x202   :  { %v115_v29 = vmul.f32 %v3763_v28, %v3761_v19  ;;  %v3650_v19 = vld [vmem:[%s4816_s2 + $0x38] sm:$0xff]  }
 0x203   :  { %v3654_v28 = vld [vmem:[%s4816_s2 + $0x18] sm:$0xff]  }
 0x204   :  { %116 = vst [vmem:[#allocation2] sm:$0x1] %v115_v29  ;;  %v117_v30 = vpack.c.bf16 %v115_v29, %v115_v29  ;;  %v3655_v29 = vld [vmem:[%s4816_s2 + $0x10] sm:$0xff]  }
 0x206   :  { %3266 = vmatmul.mubr.bf16.vlgmr.msra.gmra.mxu1 %v117_v30  ;;  %v3656_v30 = vld [vmem:[%s4816_s2 + $0x8] sm:$0xff]  }
 0x207   :  { %3313 = vmatprep.mubr.msk.bf16.mxu1 %vm3902_vm0, %v3901_v1  ;;  %3298 = vmatpush3.bf16.msra.mxu1 %v3650_v19 }
 0x208   :  { %3299 = vmatprep.subr.bf16.mxu1 %v3901_v1 }
 0x20b   :  { %3300 = vmatpush3.bf16.msra.mxu1 %v3651_v20 }
 0x20c   :  { %3301 = vmatprep.subr.bf16.mxu1 %v3901_v1 }
 0x20f   :  { %3302 = vmatpush3.bf16.msra.mxu1 %v3652_v21 }
 0x210   :  { %3303 = vmatprep.subr.bf16.mxu1 %v3901_v1 }
 0x213   :  { %3304 = vmatpush3.bf16.msra.mxu1 %v3653_v22 }
 0x214   :  { %3305 = vmatprep.subr.bf16.mxu1 %v3901_v1 }
 0x217   :  { %3306 = vmatpush3.bf16.msra.mxu1 %v3654_v28  ;;  %v3669_v28 = vld [vmem:[%s4816_s2 + $0x20] sm:$0xff]  }
 0x218   :  { %3307 = vmatprep.subr.bf16.mxu1 %v3901_v1 }
 0x21b   :  { %3308 = vmatpush3.bf16.msra.mxu1 %v3655_v29 }
 0x21c   :  { %3309 = vmatprep.subr.bf16.mxu1 %v3901_v1 }
 0x21f   :  { %3310 = vmatpush3.bf16.msra.mxu1 %v3656_v30 }
 0x220   :  { %3311 = vmatprep.subr.bf16.mxu1 %v3901_v1 }
 0x2c6   :  { %v216_v31 = vpop.f32.mrf.mxu1 }
 0x2c7   :  { %v223_v33 = vpack.c.bf16 %v216_v31, %v216_v31  ;;  %v3657_v31 = vld [vmem:[%s4816_s2] sm:$0xff]  }
 0x2c8   :  { %v3267_v34 = vpop.f32.mrf.mxu1  ;;  %3312 = vmatpush3.bf16.msra.mxu1 %v3657_v31 }
 0x2c9   :  { %3274 = vmatmul.mubr.msk.bf16.vlgmr.msra.gmra.mxu0 %vm59_vm1, %v223_v33  ;;  %3345 = vmatprep.subr.bf16.mxu1 %v3901_v1  ;;  %v3659_v33 = vld [vmem:[%s4820_s6] sm:$0xff]  }
 0x2ca   :  { %v219_v35 = vpop.f32.mrf.mxu1  ;;  %3278 = vmatpush3.bf16.msra.mxu0 %v3644_v32  ;;  %3285 = vmatprep.mubr.msk.bf16.mxu0 %vm3902_vm0, %v3901_v1  ;;  %v3658_v32 = vld [vmem:[%s4820_s6 + $0x8] sm:$0xff]  }
 0x2cb   :  { %3279 = vmatprep.subr.bf16.mxu0 %v3901_v1 }
 0x2cc   :  { %v3268_v37 = vpop.f32.mrf.mxu1 }
 0x2ce   :  { %3280 = vmatpush3.bf16.msra.mxu0 %v3645_v36 }
 0x2cf   :  { %3281 = vmatprep.subr.bf16.mxu0 %v3901_v1 }
 0x2d2   :  { %3282 = vmatpush3.bf16.msra.mxu0 %v3646_v38 }
 0x2d3   :  { %3283 = vmatprep.subr.bf16.mxu0 %v3901_v1 }
 0x2d6   :  { %3284 = vmatpush3.bf16.msra.mxu0 %v3647_v39  ;;  %v3660_v39 = vld [vmem:[%s4821_s7 + $0x18] sm:$0xff]  }
 0x2d7   :  { %3289 = vmatprep.subr.bf16.mxu0 %v3901_v1 }
 0x389   :  { %v277_v42 = vpop.f32.mrf.mxu0 }
 0x38a   :  { %v283_v43 = vadd.f32 %v277_v42, %v222_v41 }
 0x38b   :  { %v3275_v44 = vpop.f32.mrf.mxu0 }
 0x38c   :  { %v284_v45 = vmax.f32 %v283_v43, 0.0  ;;  %v3661_v43 = vld [vmem:[%s4821_s7 + $0x10] sm:$0xff]  }
 0x38d   :  { %v280_v46 = vpop.f32.mrf.mxu0 }
 0x38e   :  { %v285_v48 = vpack.c.bf16 %v284_v45, %v284_v45  ;;  %v3662_v45 = vld [vmem:[%s4821_s7 + $0x8] sm:$0xff]   ;;  %v3663_v46 = vld [vmem:[%s4821_s7] sm:$0xff]  }
 0x38f   :  { %v3276_v49 = vpop.f32.mrf.mxu0 }
 0x390   :  { %v291_v50 = vsel %vm59_vm1, %v285_v48, %v288_v47  ;;  %v587_v47 = vld [vmem:[%s4815_s1 + $0x1] sm:$0x1] }
 0x391   :  { %3286 = vmatmul.mubr.msk.bf16.vlgmr.msra.gmra.mxu0 %vm324_vm3, %v291_v50 }
 0x392   :  { %3293 = vmatprep.mubr.msk.bf16.mxu0 %vm3902_vm0, %v3901_v1  ;;  %3290 = vmatpush3.bf16.msra.mxu0 %v3648_v5 }
 0x393   :  { %3291 = vmatprep.subr.bf16.mxu0 %v3901_v1 }
 0x396   :  { %3292 = vmatpush3.bf16.msra.mxu0 %v3649_v6 }
 0x397   :  { %3317 = vmatprep.subr.bf16.mxu0 %v3901_v1 }
 0x451   :  { %v361_v52 = vpop.f32.mrf.mxu0 }
 0x452   :  { %v362_v53 = vadd.f32 %v361_v52, %v4069_v51 }
 0x453   :  { %v3287_v54 = vpop.f32.mrf.mxu0 }
 0x454   :  { %3764 = vtanh.f32 %v362_v53  ;;  %v2939_v58 = vmul.f32 -1.442695, %v362_v53 }
 0x455   :  { %v364_v55 = vpop.f32.mrf.mxu0 }
 0x456   :  { %3766 = vpow2.f32 %v2939_v58 }
 0x457   :  { %v3288_v56 = vpop.f32.mrf.mxu0 }
 0x461   :  { %v3765_v57 = vpop.eup %3764 }
 0x462   :  { %384 = vrot.lane.b32.xlu1 %v3765_v57, %s3904_s19 }
 0x463   :  { %v3767_v59 = vpop.eup %3766 }
 0x464   :  { %v370_v60 = vadd.f32 1.0, %v3767_v59 }
 0x466   :  { %3768 = vrcp.f32 %v370_v60 }
 0x473   :  { %v3769_v61 = vpop.eup %3768 }
 0x474   :  { %v382_v2 = vmul.f32 %v3769_v61, %v380_v0 }
 0x4d4   :  { %v385_v62 = vpop.permute.xlu1 %384 }
 0x4d5   :  { %v387_v63 = vmul.f32 %v3769_v61, %v385_v62 }
 0x4d7   :  { %389 = vrot.lane.b32.xlu1 %v387_v63, %s3903_s3 }
 0x549   :  { %v390_v3 = vpop.permute.xlu1 %389 }
 0x54a   :  { %v4074_v4 = vadd.f32 %v390_v3, %v382_v2 }
 0x54c   :  { %3770 = vtanh.f32 %v4074_v4 }
 0x559   :  { %v3771_v7 = vpop.eup %3770 }
 0x55a   :  { %395 = vrot.lane.b32.xlu1 %v3771_v7, %s3904_s19 }
 0x5cc   :  { %v396_v8 = vpop.permute.xlu1 %395 }
 0x5cd   :  { %v4086_v9 = vmul.f32 %v3769_v61, %v396_v8 }
 0x5cf   :  { %v405_v10 = vpack.c.bf16 %v4086_v9, %v4086_v9 }
 0x5d1   :  { %412 = vrot.lane.b32.xlu1 %v405_v10, %s3903_s3 }
 0x643   :  { %v413_v11 = vpop.permute.xlu1 %412 }
 0x644   :  { %3294 = vmatmul.mubr.msk.bf16.vlgmr.msra.gmra.mxu0 %vm59_vm1, %v413_v11 }
 0x645   :  { %3321 = vmatprep.mubr.msk.bf16.mxu0 %vm3902_vm0, %v3901_v1  ;;  %3318 = vmatpush3.bf16.msra.mxu0 %v3658_v32 }
 0x646   :  { %3319 = vmatprep.subr.bf16.mxu0 %v3901_v1 }
 0x649   :  { %3320 = vmatpush3.bf16.msra.mxu0 %v3659_v33 }
 0x64a   :  { %3325 = vmatprep.subr.bf16.mxu0 %v3901_v1 }
 0x704   :  { %v463_v13 = vpop.f32.mrf.mxu0 }
 0x705   :  { %v469_v14 = vadd.f32 %v463_v13, %v406_v12  ;;  %v3664_v12 = vld [vmem:[%s4819_s5 + $0x8] sm:$0xff]   ;;  %v3665_v13 = vld [vmem:[%s4819_s5] sm:$0xff]  }
 0x706   :  { %v3295_v15 = vpop.f32.mrf.mxu0 }
 0x707   :  { %v470_v16 = vsel %vm104_vm2, %v469_v14, -inf }
 0x708   :  { %471 = vmax.xlane.f32.xlu1 %v470_v16  ;;  %v466_v17 = vpop.f32.mrf.mxu0 }
 0x70a   :  { %v3296_v18 = vpop.f32.mrf.mxu0 }
 0x70b   :  { %v760_v18 = vld [vmem:[%s4814_s0 + $0x2] sm:$0x1] }
 0x719   :  { %651 = vrot.lane.b32.xlu1 %v405_v10, %s3904_s19 }
 0x791   :  { %v472_v23 = vpop.xlane.xlu1 %471 }
 0x792   :  { %v473_v24 = vsub.f32 %v469_v14, %v472_v23 }
 0x794   :  { %v474_v25 = vmul.f32 1.442695, %v473_v24 }
 0x795   :  { %v652_v55 = vpop.permute.xlu1 %651 }
 0x796   :  { %3772 = vpow2.f32 %v474_v25  ;;  %v3666_v25 = vld [vmem:[%s4816_s2 + $0x38] sm:$0xff]  }
 0x7a3   :  { %v3773_v26 = vpop.eup %3772 }
 0x7a4   :  { %v476_v27 = vsel %vm104_vm2, %v3773_v26, 0.0 }
 0x7a5   :  { %477 = vadd.xlane.f32.xlu0 %v476_v27  ;;  %v3668_v27 = vld [vmem:[%s4816_s2 + $0x28] sm:$0xff]  }
 0x82e   :  { %v478_v34 = vpop.xlane.xlu0 %477 }
 0x82f   :  { %3774 = vrcp.f32 %v478_v34  ;;  %v3670_v34 = vld [vmem:[%s4816_s2 + $0x18] sm:$0xff]  }
 0x83c   :  { %v3775_v35 = vpop.eup %3774 }
 0x83d   :  { %v480_v36 = vmul.f32 %v3775_v35, %v3773_v26  ;;  %v3667_v26 = vld [vmem:[%s4816_s2 + $0x30] sm:$0xff]  }
 0x83e   :  { %v3671_v35 = vld [vmem:[%s4816_s2 + $0x10] sm:$0xff]  }
 0x83f   :  { %481 = vst [vmem:[#allocation2 + $0x1] sm:$0x1] %v480_v36  ;;  %v482_v37 = vpack.c.bf16 %v480_v36, %v480_v36  ;;  %v3672_v36 = vld [vmem:[%s4816_s2 + $0x8] sm:$0xff]  }
 0x841   :  { %3314 = vmatmul.mubr.bf16.vlgmr.msra.gmra.mxu1 %v482_v37  ;;  %v3673_v37 = vld [vmem:[%s4816_s2] sm:$0xff]  }
 0x842   :  { %3361 = vmatprep.mubr.msk.bf16.mxu1 %vm3902_vm0, %v3901_v1  ;;  %3346 = vmatpush3.bf16.msra.mxu1 %v3666_v25  ;;  %v1114_v25 = vld [vmem:[%s4814_s0 + $0x3] sm:$0x1] }
 0x843   :  { %3347 = vmatprep.subr.bf16.mxu1 %v3901_v1 }
 0x846   :  { %3348 = vmatpush3.bf16.msra.mxu1 %v3667_v26 }
 0x847   :  { %3349 = vmatprep.subr.bf16.mxu1 %v3901_v1 }
 0x84a   :  { %3350 = vmatpush3.bf16.msra.mxu1 %v3668_v27 }
 0x84b   :  { %3351 = vmatprep.subr.bf16.mxu1 %v3901_v1 }
 0x84e   :  { %3352 = vmatpush3.bf16.msra.mxu1 %v3669_v28 }
 0x84f   :  { %3353 = vmatprep.subr.bf16.mxu1 %v3901_v1 }
 0x852   :  { %3354 = vmatpush3.bf16.msra.mxu1 %v3670_v34  ;;  %v3684_v34 = vld [vmem:[%s4816_s2 + $0x28] sm:$0xff]  }
 0x853   :  { %3355 = vmatprep.subr.bf16.mxu1 %v3901_v1 }
 0x856   :  { %3356 = vmatpush3.bf16.msra.mxu1 %v3671_v35  ;;  %v3685_v35 = vld [vmem:[%s4816_s2 + $0x20] sm:$0xff]  }
 0x857   :  { %3357 = vmatprep.subr.bf16.mxu1 %v3901_v1 }
 0x85a   :  { %3358 = vmatpush3.bf16.msra.mxu1 %v3672_v36 }
 0x85b   :  { %3359 = vmatprep.subr.bf16.mxu1 %v3901_v1 }
 0x85e   :  { %3360 = vmatpush3.bf16.msra.mxu1 %v3673_v37 }
 0x85f   :  { %3393 = vmatprep.subr.bf16.mxu1 %v3901_v1 }
 0x901   :  { %v581_v38 = vpop.f32.mrf.mxu1 }
 0x902   :  { %v588_v40 = vpack.c.bf16 %v581_v38, %v581_v38  ;;  %v3674_v38 = vld [vmem:[%s4820_s6 + $0x8] sm:$0xff]  }
 0x903   :  { %v3315_v41 = vpop.f32.mrf.mxu1 }
 0x904   :  { %3322 = vmatmul.mubr.msk.bf16.vlgmr.msra.gmra.mxu0 %vm59_vm1, %v588_v40 }
 0x905   :  { %v584_v42 = vpop.f32.mrf.mxu1  ;;  %3326 = vmatpush3.bf16.msra.mxu0 %v3660_v39  ;;  %3333 = vmatprep.mubr.msk.bf16.mxu0 %vm3902_vm0, %v3901_v1  ;;  %v3675_v39 = vld [vmem:[%s4820_s6] sm:$0xff]  }
 0x906   :  { %3327 = vmatprep.subr.bf16.mxu0 %v3901_v1 }
 0x907   :  { %v3316_v44 = vpop.f32.mrf.mxu1 }
 0x909   :  { %3328 = vmatpush3.bf16.msra.mxu0 %v3661_v43 }
 0x90a   :  { %3329 = vmatprep.subr.bf16.mxu0 %v3901_v1 }
 0x90d   :  { %3330 = vmatpush3.bf16.msra.mxu0 %v3662_v45  ;;  %v3676_v45 = vld [vmem:[%s4821_s7 + $0x18] sm:$0xff]  }
 0x90e   :  { %3331 = vmatprep.subr.bf16.mxu0 %v3901_v1 }
 0x911   :  { %3332 = vmatpush3.bf16.msra.mxu0 %v3663_v46 }
 0x912   :  { %3337 = vmatprep.subr.bf16.mxu0 %v3901_v1 }
 0x9c4   :  { %v642_v48 = vpop.f32.mrf.mxu0 }
 0x9c5   :  { %v648_v49 = vadd.f32 %v642_v48, %v587_v47 }
 0x9c6   :  { %v3323_v50 = vpop.f32.mrf.mxu0 }
 0x9c7   :  { %v649_v52 = vmax.f32 %v648_v49, 0.0  ;;  %v3677_v49 = vld [vmem:[%s4821_s7 + $0x10] sm:$0xff]  }
 0x9c8   :  { %v645_v53 = vpop.f32.mrf.mxu0 }
 0x9c9   :  { %v650_v54 = vpack.c.bf16 %v649_v52, %v649_v52  ;;  %v3678_v52 = vld [vmem:[%s4821_s7 + $0x8] sm:$0xff]   ;;  %v3679_v53 = vld [vmem:[%s4821_s7] sm:$0xff]  }
 0x9ca   :  { %v3324_v56 = vpop.f32.mrf.mxu0 }
 0x9cb   :  { %v655_v57 = vsel %vm59_vm1, %v650_v54, %v652_v55  ;;  %v941_v54 = vld [vmem:[%s4815_s1 + $0x2] sm:$0x1] }
 0x9cc   :  { %3334 = vmatmul.mubr.msk.bf16.vlgmr.msra.gmra.mxu0 %vm324_vm3, %v655_v57 }
 0x9cd   :  { %3341 = vmatprep.mubr.msk.bf16.mxu0 %vm3902_vm0, %v3901_v1  ;;  %3338 = vmatpush3.bf16.msra.mxu0 %v3664_v12 }
 0x9ce   :  { %3339 = vmatprep.subr.bf16.mxu0 %v3901_v1 }
 0x9d1   :  { %3340 = vmatpush3.bf16.msra.mxu0 %v3665_v13 }
 0x9d2   :  { %3365 = vmatprep.subr.bf16.mxu0 %v3901_v1 }
 0xa8c   :  { %v724_v58 = vpop.f32.mrf.mxu0 }
 0xa8d   :  { %v725_v59 = vadd.f32 %v724_v58, %v4069_v51 }
 0xa8e   :  { %v3335_v60 = vpop.f32.mrf.mxu0 }
 0xa8f   :  { %3776 = vtanh.f32 %v725_v59  ;;  %v2960_v0 = vmul.f32 -1.442695, %v725_v59 }
 0xa90   :  { %v727_v61 = vpop.f32.mrf.mxu0 }
 0xa91   :  { %3778 = vpow2.f32 %v2960_v0 }
 0xa92   :  { %v3336_v62 = vpop.f32.mrf.mxu0 }
 0xa9c   :  { %v3777_v63 = vpop.eup %3776 }
 0xa9d   :  { %739 = vrot.lane.b32.xlu0 %v3777_v63, %s3904_s19 }
 0xa9e   :  { %v3779_v2 = vpop.eup %3778 }
 0xa9f   :  { %v733_v3 = vadd.f32 1.0, %v3779_v2 }
 0xaa1   :  { %3780 = vrcp.f32 %v733_v3 }
 0xaae   :  { %v3781_v5 = vpop.eup %3780 }
 0xaaf   :  { %v737_v8 = vmul.f32 %v3781_v5, %v4074_v4 }
 0xb0f   :  { %v740_v6 = vpop.permute.xlu0 %739 }
 0xb10   :  { %v742_v7 = vmul.f32 %v3781_v5, %v740_v6 }
 0xb12   :  { %744 = vrot.lane.b32.xlu1 %v742_v7, %s3903_s3 }
 0xb84   :  { %v745_v10 = vpop.permute.xlu1 %744 }
 0xb85   :  { %v4172_v11 = vadd.f32 %v745_v10, %v737_v8 }
 0xb87   :  { %3782 = vtanh.f32 %v4172_v11 }
 0xb94   :  { %v3783_v4 = vpop.eup %3782 }
 0xb95   :  { %750 = vrot.lane.b32.xlu1 %v3783_v4, %s3904_s19 }
 0xc07   :  { %v751_v14 = vpop.permute.xlu1 %750 }
 0xc08   :  { %v4184_v15 = vmul.f32 %v3781_v5, %v751_v14 }
 0xc0a   :  { %v759_v16 = vpack.c.bf16 %v4184_v15, %v4184_v15 }
 0xc0c   :  { %766 = vrot.lane.b32.xlu1 %v759_v16, %s3903_s3 }
 0xc7e   :  { %v767_v17 = vpop.permute.xlu1 %766 }
 0xc7f   :  { %3342 = vmatmul.mubr.msk.bf16.vlgmr.msra.gmra.mxu0 %vm59_vm1, %v767_v17 }
 0xc80   :  { %3369 = vmatprep.mubr.msk.bf16.mxu0 %vm3902_vm0, %v3901_v1  ;;  %3366 = vmatpush3.bf16.msra.mxu0 %v3674_v38 }
 0xc81   :  { %3367 = vmatprep.subr.bf16.mxu0 %v3901_v1 }
 0xc84   :  { %3368 = vmatpush3.bf16.msra.mxu0 %v3675_v39 }
 0xc85   :  { %3373 = vmatprep.subr.bf16.mxu0 %v3901_v1 }
 0xd3f   :  { %v817_v19 = vpop.f32.mrf.mxu0 }
 0xd40   :  { %v823_v20 = vadd.f32 %v817_v19, %v760_v18  ;;  %v3680_v19 = vld [vmem:[%s4819_s5 + $0x8] sm:$0xff]  }
 0xd41   :  { %v3343_v21 = vpop.f32.mrf.mxu0 }
 0xd42   :  { %v824_v22 = vsel %vm104_vm2, %v823_v20, -inf }
 0xd43   :  { %825 = vmax.xlane.f32.xlu0 %v824_v22  ;;  %v820_v23 = vpop.f32.mrf.mxu0 }
 0xd45   :  { %v3344_v24 = vpop.f32.mrf.mxu0 }
 0xd59   :  { %1005 = vrot.lane.b32.xlu0 %v759_v16, %s3904_s19 }
 0xdcc   :  { %v826_v29 = vpop.xlane.xlu0 %825 }
 0xdcd   :  { %v827_v30 = vsub.f32 %v823_v20, %v826_v29  ;;  %v3681_v20 = vld [vmem:[%s4819_s5] sm:$0xff]  }
 0xdcf   :  { %v828_v31 = vmul.f32 1.442695, %v827_v30 }
 0xdd0   :  { %v1006_v61 = vpop.permute.xlu0 %1005 }
 0xdd1   :  { %3784 = vpow2.f32 %v828_v31 }
 0xdde   :  { %v3785_v32 = vpop.eup %3784 }
 0xddf   :  { %v830_v33 = vsel %vm104_vm2, %v3785_v32, 0.0 }
 0xde0   :  { %831 = vadd.xlane.f32.xlu1 %v830_v33  ;;  %v3683_v33 = vld [vmem:[%s4816_s2 + $0x30] sm:$0xff]  }
 0xe69   :  { %v832_v40 = vpop.xlane.xlu1 %831 }
 0xe6a   :  { %3786 = vrcp.f32 %v832_v40 }
 0xe77   :  { %v3787_v41 = vpop.eup %3786 }
 0xe78   :  { %v834_v42 = vmul.f32 %v3787_v41, %v3785_v32  ;;  %v3682_v32 = vld [vmem:[%s4816_s2 + $0x38] sm:$0xff]  }
 0xe79   :  { %v3686_v41 = vld [vmem:[%s4816_s2 + $0x18] sm:$0xff]  }
 0xe7a   :  { %835 = vst [vmem:[#allocation2 + $0x2] sm:$0x1] %v834_v42  ;;  %v836_v43 = vpack.c.bf16 %v834_v42, %v834_v42  ;;  %v3687_v42 = vld [vmem:[%s4816_s2 + $0x10] sm:$0xff]  }
 0xe7c   :  { %3362 = vmatmul.mubr.bf16.vlgmr.msra.gmra.mxu1 %v836_v43  ;;  %v3688_v43 = vld [vmem:[%s4816_s2 + $0x8] sm:$0xff]  }
 0xe7d   :  { %3409 = vmatprep.mubr.msk.bf16.mxu1 %vm3902_vm0, %v3901_v1  ;;  %3394 = vmatpush3.bf16.msra.mxu1 %v3682_v32 }
 0xe7e   :  { %3395 = vmatprep.subr.bf16.mxu1 %v3901_v1 }
 0xe81   :  { %3396 = vmatpush3.bf16.msra.mxu1 %v3683_v33  ;;  %v1468_v33 = vld [vmem:[%s4814_s0 + $0x4] sm:$0x1] }
 0xe82   :  { %3397 = vmatprep.subr.bf16.mxu1 %v3901_v1 }
 0xe85   :  { %3398 = vmatpush3.bf16.msra.mxu1 %v3684_v34 }
 0xe86   :  { %3399 = vmatprep.subr.bf16.mxu1 %v3901_v1 }
 0xe89   :  { %3400 = vmatpush3.bf16.msra.mxu1 %v3685_v35 }
 0xe8a   :  { %3401 = vmatprep.subr.bf16.mxu1 %v3901_v1 }
 0xe8d   :  { %3402 = vmatpush3.bf16.msra.mxu1 %v3686_v41  ;;  %v3699_v41 = vld [vmem:[%s4816_s2 + $0x30] sm:$0xff]  }
 0xe8e   :  { %3403 = vmatprep.subr.bf16.mxu1 %v3901_v1 }
 0xe91   :  { %3404 = vmatpush3.bf16.msra.mxu1 %v3687_v42  ;;  %v3700_v42 = vld [vmem:[%s4816_s2 + $0x28] sm:$0xff]  }
 0xe92   :  { %3405 = vmatprep.subr.bf16.mxu1 %v3901_v1 }
 0xe95   :  { %3406 = vmatpush3.bf16.msra.mxu1 %v3688_v43  ;;  %v3701_v43 = vld [vmem:[%s4816_s2 + $0x20] sm:$0xff]  }
 0xe96   :  { %3407 = vmatprep.subr.bf16.mxu1 %v3901_v1 }
 0xf3c   :  { %v935_v44 = vpop.f32.mrf.mxu1 }
 0xf3d   :  { %v942_v46 = vpack.c.bf16 %v935_v44, %v935_v44  ;;  %v3689_v44 = vld [vmem:[%s4816_s2] sm:$0xff]  }
 0xf3e   :  { %v3363_v47 = vpop.f32.mrf.mxu1  ;;  %3408 = vmatpush3.bf16.msra.mxu1 %v3689_v44 }
 0xf3f   :  { %3370 = vmatmul.mubr.msk.bf16.vlgmr.msra.gmra.mxu0 %vm59_vm1, %v942_v46  ;;  %3441 = vmatprep.subr.bf16.mxu1 %v3901_v1  ;;  %v3691_v46 = vld [vmem:[%s4820_s6] sm:$0xff]  }
 0xf40   :  { %v938_v48 = vpop.f32.mrf.mxu1  ;;  %3374 = vmatpush3.bf16.msra.mxu0 %v3676_v45  ;;  %3381 = vmatprep.mubr.msk.bf16.mxu0 %vm3902_vm0, %v3901_v1  ;;  %v3690_v45 = vld [vmem:[%s4820_s6 + $0x8] sm:$0xff]  }
 0xf41   :  { %3375 = vmatprep.subr.bf16.mxu0 %v3901_v1 }
 0xf42   :  { %v3364_v50 = vpop.f32.mrf.mxu1 }
 0xf44   :  { %3376 = vmatpush3.bf16.msra.mxu0 %v3677_v49 }
 0xf45   :  { %3377 = vmatprep.subr.bf16.mxu0 %v3901_v1 }
 0xf48   :  { %3378 = vmatpush3.bf16.msra.mxu0 %v3678_v52 }
 0xf49   :  { %3379 = vmatprep.subr.bf16.mxu0 %v3901_v1 }
 0xf4c   :  { %3380 = vmatpush3.bf16.msra.mxu0 %v3679_v53  ;;  %v3692_v53 = vld [vmem:[%s4821_s7 + $0x18] sm:$0xff]  }
 0xf4d   :  { %3385 = vmatprep.subr.bf16.mxu0 %v3901_v1 }
 0xfff   :  { %v996_v55 = vpop.f32.mrf.mxu0 }
0x1000   :  { %v1002_v56 = vadd.f32 %v996_v55, %v941_v54 }
0x1001   :  { %v3371_v57 = vpop.f32.mrf.mxu0 }
0x1002   :  { %v1003_v58 = vmax.f32 %v1002_v56, 0.0  ;;  %v3693_v57 = vld [vmem:[%s4821_s7 + $0x10] sm:$0xff]  }
0x1003   :  { %v999_v59 = vpop.f32.mrf.mxu0 }
0x1004   :  { %v1004_v60 = vpack.c.bf16 %v1003_v58, %v1003_v58  ;;  %v3694_v59 = vld [vmem:[%s4821_s7 + $0x8] sm:$0xff]  }
0x1005   :  { %v3372_v62 = vpop.f32.mrf.mxu0 }
0x1006   :  { %v1009_v63 = vsel %vm59_vm1, %v1004_v60, %v1006_v61  ;;  %v3695_v60 = vld [vmem:[%s4821_s7] sm:$0xff]  }
0x1007   :  { %3382 = vmatmul.mubr.msk.bf16.vlgmr.msra.gmra.mxu0 %vm324_vm3, %v1009_v63  ;;  %v1295_v61 = vld [vmem:[%s4815_s1 + $0x3] sm:$0x1] }
0x1008   :  { %3389 = vmatprep.mubr.msk.bf16.mxu0 %vm3902_vm0, %v3901_v1  ;;  %3386 = vmatpush3.bf16.msra.mxu0 %v3680_v19 }
0x1009   :  { %3387 = vmatprep.subr.bf16.mxu0 %v3901_v1 }
0x100c   :  { %3388 = vmatpush3.bf16.msra.mxu0 %v3681_v20 }
0x100d   :  { %3413 = vmatprep.subr.bf16.mxu0 %v3901_v1 }
0x10c7   :  { %v1078_v0 = vpop.f32.mrf.mxu0 }
0x10c8   :  { %v1079_v2 = vadd.f32 %v1078_v0, %v4069_v51 }
0x10c9   :  { %v3383_v3 = vpop.f32.mrf.mxu0 }
0x10ca   :  { %3788 = vtanh.f32 %v1079_v2  ;;  %v2980_v8 = vmul.f32 -1.442695, %v1079_v2 }
0x10cb   :  { %v1081_v5 = vpop.f32.mrf.mxu0 }
0x10cc   :  { %3790 = vpow2.f32 %v2980_v8 }
0x10cd   :  { %v3384_v6 = vpop.f32.mrf.mxu0 }
0x10d7   :  { %v3789_v7 = vpop.eup %3788 }
0x10d8   :  { %1093 = vrot.lane.b32.xlu1 %v3789_v7, %s3904_s19 }
0x10d9   :  { %v3791_v10 = vpop.eup %3790 }
0x10da   :  { %v1087_v12 = vadd.f32 1.0, %v3791_v10 }
0x10dc   :  { %3792 = vrcp.f32 %v1087_v12 }
0x10e9   :  { %v3793_v13 = vpop.eup %3792 }
0x10ea   :  { %v1091_v16 = vmul.f32 %v3793_v13, %v4172_v11 }
0x114a   :  { %v1094_v4 = vpop.permute.xlu1 %1093 }
0x114b   :  { %v1096_v14 = vmul.f32 %v3793_v13, %v1094_v4 }
0x114d   :  { %1098 = vrot.lane.b32.xlu0 %v1096_v14, %s3903_s3 }
0x11bf   :  { %v1099_v17 = vpop.permute.xlu0 %1098 }
0x11c0   :  { %v4270_v18 = vadd.f32 %v1099_v17, %v1091_v16 }
0x11c2   :  { %3794 = vtanh.f32 %v4270_v18 }
0x11cf   :  { %v3795_v11 = vpop.eup %3794 }
0x11d0   :  { %1104 = vrot.lane.b32.xlu1 %v3795_v11, %s3904_s19 }
0x1242   :  { %v1105_v21 = vpop.permute.xlu1 %1104 }
0x1243   :  { %v4282_v22 = vmul.f32 %v3793_v13, %v1105_v21 }
0x1245   :  { %v1113_v23 = vpack.c.bf16 %v4282_v22, %v4282_v22 }
0x1247   :  { %1120 = vrot.lane.b32.xlu0 %v1113_v23, %s3903_s3 }
0x12b9   :  { %v1121_v24 = vpop.permute.xlu0 %1120 }
0x12ba   :  { %3390 = vmatmul.mubr.msk.bf16.vlgmr.msra.gmra.mxu0 %vm59_vm1, %v1121_v24 }
0x12bb   :  { %3417 = vmatprep.mubr.msk.bf16.mxu0 %vm3902_vm0, %v3901_v1  ;;  %3414 = vmatpush3.bf16.msra.mxu0 %v3690_v45 }
0x12bc   :  { %3415 = vmatprep.subr.bf16.mxu0 %v3901_v1 }
0x12bf   :  { %3416 = vmatpush3.bf16.msra.mxu0 %v3691_v46 }
0x12c0   :  { %3421 = vmatprep.subr.bf16.mxu0 %v3901_v1 }
0x137a   :  { %v1171_v26 = vpop.f32.mrf.mxu0 }
0x137b   :  { %v1177_v27 = vadd.f32 %v1171_v26, %v1114_v25 }
0x137c   :  { %v3391_v28 = vpop.f32.mrf.mxu0 }
0x137d   :  { %v1178_v29 = vsel %vm104_vm2, %v1177_v27, -inf  ;;  %v3697_v28 = vld [vmem:[%s4819_s5] sm:$0xff]  }
0x137e   :  { %1179 = vmax.xlane.f32.xlu1 %v1178_v29  ;;  %v1174_v30 = vpop.f32.mrf.mxu0 }
0x1380   :  { %v3392_v31 = vpop.f32.mrf.mxu0 }
0x1407   :  { %v1180_v36 = vpop.xlane.xlu1 %1179 }
0x1408   :  { %v1181_v37 = vsub.f32 %v1177_v27, %v1180_v36  ;;  %v3696_v27 = vld [vmem:[%s4819_s5 + $0x8] sm:$0xff]  }
0x140a   :  { %v1182_v38 = vmul.f32 1.442695, %v1181_v37 }
0x140c   :  { %3796 = vpow2.f32 %v1182_v38 }
0x1419   :  { %v3797_v39 = vpop.eup %3796 }
0x141a   :  { %v1184_v40 = vsel %vm104_vm2, %v3797_v39, 0.0 }
0x141b   :  { %1185 = vadd.xlane.f32.xlu0 %v1184_v40  ;;  %v3698_v40 = vld [vmem:[%s4816_s2 + $0x38] sm:$0xff]  }
0x1431   :  { %1359 = vrot.lane.b32.xlu0 %v1113_v23, %s3904_s19 }
0x14a4   :  { %v1186_v47 = vpop.xlane.xlu0 %1185 }
0x14a5   :  { %3798 = vrcp.f32 %v1186_v47 }
0x14a8   :  { %v1360_v6 = vpop.permute.xlu0 %1359 }
0x14b2   :  { %v3799_v48 = vpop.eup %3798 }
0x14b3   :  { %v1188_v49 = vmul.f32 %v3799_v48, %v3797_v39 }
0x14b5   :  { %1189 = vst [vmem:[#allocation2 + $0x3] sm:$0x1] %v1188_v49  ;;  %v1190_v50 = vpack.c.bf16 %v1188_v49, %v1188_v49  ;;  %v3702_v49 = vld [vmem:[%s4816_s2 + $0x18] sm:$0xff]  }
0x14b7   :  { %3410 = vmatmul.mubr.bf16.vlgmr.msra.gmra.mxu1 %v1190_v50  ;;  %v3703_v50 = vld [vmem:[%s4816_s2 + $0x10] sm:$0xff]  }
0x14b8   :  { %3457 = vmatprep.mubr.msk.bf16.mxu1 %vm3902_vm0, %v3901_v1  ;;  %3442 = vmatpush3.bf16.msra.mxu1 %v3698_v40 }
0x14b9   :  { %3443 = vmatprep.subr.bf16.mxu1 %v3901_v1 }
0x14bc   :  { %3444 = vmatpush3.bf16.msra.mxu1 %v3699_v41  ;;  %v1822_v41 = vld [vmem:[%s4814_s0 + $0x5] sm:$0x1] }
0x14bd   :  { %3445 = vmatprep.subr.bf16.mxu1 %v3901_v1 }
0x14c0   :  { %3446 = vmatpush3.bf16.msra.mxu1 %v3700_v42 }
0x14c1   :  { %3447 = vmatprep.subr.bf16.mxu1 %v3901_v1 }
0x14c4   :  { %3448 = vmatpush3.bf16.msra.mxu1 %v3701_v43 }
0x14c5   :  { %3449 = vmatprep.subr.bf16.mxu1 %v3901_v1 }
0x14c8   :  { %3450 = vmatpush3.bf16.msra.mxu1 %v3702_v49  ;;  %v3715_v49 = vld [vmem:[%s4816_s2 + $0x30] sm:$0xff]  }
0x14c9   :  { %3451 = vmatprep.subr.bf16.mxu1 %v3901_v1 }
0x14cc   :  { %3452 = vmatpush3.bf16.msra.mxu1 %v3703_v50  ;;  %v3716_v50 = vld [vmem:[%s4816_s2 + $0x28] sm:$0xff]  }
0x14cd   :  { %3453 = vmatprep.subr.bf16.mxu1 %v3901_v1 }
0x1577   :  { %v1289_v52 = vpop.f32.mrf.mxu1 }
0x1578   :  { %v1296_v54 = vpack.c.bf16 %v1289_v52, %v1289_v52  ;;  %v3704_v52 = vld [vmem:[%s4816_s2 + $0x8] sm:$0xff]  }
0x1579   :  { %v3411_v55 = vpop.f32.mrf.mxu1  ;;  %3454 = vmatpush3.bf16.msra.mxu1 %v3704_v52  ;;  %v3717_v52 = vld [vmem:[%s4816_s2 + $0x20] sm:$0xff]  }
0x157a   :  { %3418 = vmatmul.mubr.msk.bf16.vlgmr.msra.gmra.mxu0 %vm59_vm1, %v1296_v54  ;;  %3455 = vmatprep.subr.bf16.mxu1 %v3901_v1  ;;  %v3706_v54 = vld [vmem:[%s4820_s6 + $0x8] sm:$0xff]   ;;  %v3707_v55 = vld [vmem:[%s4820_s6] sm:$0xff]  }
0x157b   :  { %v1292_v56 = vpop.f32.mrf.mxu1  ;;  %3422 = vmatpush3.bf16.msra.mxu0 %v3692_v53  ;;  %3429 = vmatprep.mubr.msk.bf16.mxu0 %vm3902_vm0, %v3901_v1  ;;  %v3705_v53 = vld [vmem:[%s4816_s2] sm:$0xff]  }
0x157c   :  { %3423 = vmatprep.subr.bf16.mxu0 %v3901_v1 }
0x157d   :  { %v3412_v58 = vpop.f32.mrf.mxu1  ;;  %3456 = vmatpush3.bf16.msra.mxu1 %v3705_v53 }
0x157e   :  { %3489 = vmatprep.subr.bf16.mxu1 %v3901_v1 }
0x157f   :  { %3424 = vmatpush3.bf16.msra.mxu0 %v3693_v57 }
0x1580   :  { %3425 = vmatprep.subr.bf16.mxu0 %v3901_v1 }
0x1583   :  { %3426 = vmatpush3.bf16.msra.mxu0 %v3694_v59 }
0x1584   :  { %3427 = vmatprep.subr.bf16.mxu0 %v3901_v1 }
0x1587   :  { %3428 = vmatpush3.bf16.msra.mxu0 %v3695_v60 }
0x1588   :  { %3433 = vmatprep.subr.bf16.mxu0 %v3901_v1 }
0x163a   :  { %v1350_v62 = vpop.f32.mrf.mxu0 }
0x163b   :  { %v1356_v63 = vadd.f32 %v1350_v62, %v1295_v61  ;;  %v3708_v61 = vld [vmem:[%s4821_s7 + $0x18] sm:$0xff]  }
0x163c   :  { %v3419_v0 = vpop.f32.mrf.mxu0 }
0x163d   :  { %v1357_v2 = vmax.f32 %v1356_v63, 0.0 }
0x163e   :  { %v1353_v3 = vpop.f32.mrf.mxu0 }
0x163f   :  { %v1358_v5 = vpack.c.bf16 %v1357_v2, %v1357_v2  ;;  %v3709_v2 = vld [vmem:[%s4821_s7 + $0x10] sm:$0xff]  }
0x1640   :  { %v3420_v7 = vpop.f32.mrf.mxu0 }
0x1641   :  { %v1363_v8 = vsel %vm59_vm1, %v1358_v5, %v1360_v6  ;;  %v3710_v5 = vld [vmem:[%s4821_s7 + $0x8] sm:$0xff]   ;;  %v3711_v6 = vld [vmem:[%s4821_s7] sm:$0xff]  }
0x1642   :  { %3430 = vmatmul.mubr.msk.bf16.vlgmr.msra.gmra.mxu0 %vm324_vm3, %v1363_v8  ;;  %v1649_v7 = vld [vmem:[%s4815_s1 + $0x4] sm:$0x1] }
0x1643   :  { %3437 = vmatprep.mubr.msk.bf16.mxu0 %vm3902_vm0, %v3901_v1  ;;  %3434 = vmatpush3.bf16.msra.mxu0 %v3696_v27 }
0x1644   :  { %3435 = vmatprep.subr.bf16.mxu0 %v3901_v1 }
0x1647   :  { %3436 = vmatpush3.bf16.msra.mxu0 %v3697_v28 }
0x1648   :  { %3461 = vmatprep.subr.bf16.mxu0 %v3901_v1 }
0x1702   :  { %v1432_v10 = vpop.f32.mrf.mxu0 }
0x1703   :  { %v1433_v12 = vadd.f32 %v1432_v10, %v4069_v51 }
0x1704   :  { %v3431_v13 = vpop.f32.mrf.mxu0 }
0x1705   :  { %3800 = vtanh.f32 %v1433_v12  ;;  %v3000_v17 = vmul.f32 -1.442695, %v1433_v12 }
0x1706   :  { %v1435_v4 = vpop.f32.mrf.mxu0 }
0x1707   :  { %3802 = vpow2.f32 %v3000_v17 }
0x1708   :  { %v3432_v14 = vpop.f32.mrf.mxu0 }
0x1712   :  { %v3801_v16 = vpop.eup %3800 }
0x1713   :  { %1447 = vrot.lane.b32.xlu1 %v3801_v16, %s3904_s19 }
0x1714   :  { %v3803_v19 = vpop.eup %3802 }
0x1715   :  { %v1441_v20 = vadd.f32 1.0, %v3803_v19 }
0x1717   :  { %3804 = vrcp.f32 %v1441_v20 }
0x1724   :  { %v3805_v11 = vpop.eup %3804 }
0x1725   :  { %v1445_v24 = vmul.f32 %v3805_v11, %v4270_v18 }
0x1785   :  { %v1448_v21 = vpop.permute.xlu1 %1447 }
0x1786   :  { %v1450_v23 = vmul.f32 %v3805_v11, %v1448_v21 }
0x1788   :  { %1452 = vrot.lane.b32.xlu1 %v1450_v23, %s3903_s3 }
0x17fa   :  { %v1453_v25 = vpop.permute.xlu1 %1452 }
0x17fb   :  { %v4368_v26 = vadd.f32 %v1453_v25, %v1445_v24 }
0x17fd   :  { %3806 = vtanh.f32 %v4368_v26 }
0x180a   :  { %v3807_v18 = vpop.eup %3806 }
0x180b   :  { %1458 = vrot.lane.b32.xlu0 %v3807_v18, %s3904_s19 }
0x187d   :  { %v1459_v29 = vpop.permute.xlu0 %1458 }
0x187e   :  { %v4380_v30 = vmul.f32 %v3805_v11, %v1459_v29 }
0x1880   :  { %v1467_v31 = vpack.c.bf16 %v4380_v30, %v4380_v30 }
0x1882   :  { %1474 = vrot.lane.b32.xlu1 %v1467_v31, %s3903_s3 }
0x18f4   :  { %v1475_v32 = vpop.permute.xlu1 %1474 }
0x18f5   :  { %3438 = vmatmul.mubr.msk.bf16.vlgmr.msra.gmra.mxu0 %vm59_vm1, %v1475_v32 }
0x18f6   :  { %3465 = vmatprep.mubr.msk.bf16.mxu0 %vm3902_vm0, %v3901_v1  ;;  %3462 = vmatpush3.bf16.msra.mxu0 %v3706_v54 }
0x18f7   :  { %3463 = vmatprep.subr.bf16.mxu0 %v3901_v1 }
0x18fa   :  { %3464 = vmatpush3.bf16.msra.mxu0 %v3707_v55 }
0x18fb   :  { %3469 = vmatprep.subr.bf16.mxu0 %v3901_v1 }
0x19b5   :  { %v1525_v34 = vpop.f32.mrf.mxu0 }
0x19b6   :  { %v1531_v35 = vadd.f32 %v1525_v34, %v1468_v33 }
0x19b7   :  { %v3439_v36 = vpop.f32.mrf.mxu0 }
0x19b8   :  { %v1532_v37 = vsel %vm104_vm2, %v1531_v35, -inf  ;;  %v3713_v36 = vld [vmem:[%s4819_s5] sm:$0xff]  }
0x19b9   :  { %1533 = vmax.xlane.f32.xlu0 %v1532_v37  ;;  %v1528_v38 = vpop.f32.mrf.mxu0 }
0x19bb   :  { %v3440_v39 = vpop.f32.mrf.mxu0 }
0x19cf   :  { %1713 = vrot.lane.b32.xlu0 %v1467_v31, %s3904_s19 }
0x1a42   :  { %v1534_v44 = vpop.xlane.xlu0 %1533 }
0x1a43   :  { %v1535_v45 = vsub.f32 %v1531_v35, %v1534_v44  ;;  %v3712_v35 = vld [vmem:[%s4819_s5 + $0x8] sm:$0xff]  }
0x1a45   :  { %v1536_v46 = vmul.f32 1.442695, %v1535_v45 }
0x1a46   :  { %v1714_v16 = vpop.permute.xlu0 %1713 }
0x1a47   :  { %3808 = vpow2.f32 %v1536_v46 }
0x1a54   :  { %v3809_v47 = vpop.eup %3808 }
0x1a55   :  { %v1538_v48 = vsel %vm104_vm2, %v3809_v47, 0.0 }
0x1a56   :  { %1539 = vadd.xlane.f32.xlu1 %v1538_v48  ;;  %v3714_v48 = vld [vmem:[%s4816_s2 + $0x38] sm:$0xff]  }
0x1adf   :  { %v1540_v56 = vpop.xlane.xlu1 %1539 }
0x1ae0   :  { %3810 = vrcp.f32 %v1540_v56 }
0x1aed   :  { %v3811_v57 = vpop.eup %3810 }
0x1aee   :  { %v1542_v58 = vmul.f32 %v3811_v57, %v3809_v47 }
0x1af0   :  { %1543 = vst [vmem:[#allocation2 + $0x4] sm:$0x1] %v1542_v58  ;;  %v1544_v59 = vpack.c.bf16 %v1542_v58, %v1542_v58  ;;  %v3718_v58 = vld [vmem:[%s4816_s2 + $0x18] sm:$0xff]  }
0x1af2   :  { %3458 = vmatmul.mubr.bf16.vlgmr.msra.gmra.mxu1 %v1544_v59  ;;  %v3719_v59 = vld [vmem:[%s4816_s2 + $0x10] sm:$0xff]  }
0x1af3   :  { %3505 = vmatprep.mubr.msk.bf16.mxu1 %vm3902_vm0, %v3901_v1  ;;  %3490 = vmatpush3.bf16.msra.mxu1 %v3714_v48 }
0x1af4   :  { %3491 = vmatprep.subr.bf16.mxu1 %v3901_v1 }
0x1af7   :  { %3492 = vmatpush3.bf16.msra.mxu1 %v3715_v49 }
0x1af8   :  { %3493 = vmatprep.subr.bf16.mxu1 %v3901_v1 }
0x1afb   :  { %3494 = vmatpush3.bf16.msra.mxu1 %v3716_v50 }
0x1afc   :  { %3495 = vmatprep.subr.bf16.mxu1 %v3901_v1 }
0x1aff   :  { %3496 = vmatpush3.bf16.msra.mxu1 %v3717_v52  ;;  %v2176_v52 = vld [vmem:[%s4814_s0 + $0x6] sm:$0x1] }
0x1b00   :  { %3497 = vmatprep.subr.bf16.mxu1 %v3901_v1 }
0x1b03   :  { %3498 = vmatpush3.bf16.msra.mxu1 %v3718_v58 }
0x1b04   :  { %3499 = vmatprep.subr.bf16.mxu1 %v3901_v1 }
0x1b07   :  { %3500 = vmatpush3.bf16.msra.mxu1 %v3719_v59  ;;  %v3730_v59 = vld [vmem:[%s4816_s2 + $0x38] sm:$0xff]  }
0x1b08   :  { %3501 = vmatprep.subr.bf16.mxu1 %v3901_v1 }
0x1bb2   :  { %v1643_v60 = vpop.f32.mrf.mxu1 }
0x1bb3   :  { %v1650_v62 = vpack.c.bf16 %v1643_v60, %v1643_v60  ;;  %v3720_v60 = vld [vmem:[%s4816_s2 + $0x8] sm:$0xff]  }
0x1bb4   :  { %v3459_v63 = vpop.f32.mrf.mxu1  ;;  %3502 = vmatpush3.bf16.msra.mxu1 %v3720_v60  ;;  %v3731_v60 = vld [vmem:[%s4816_s2 + $0x30] sm:$0xff]  }
0x1bb5   :  { %3466 = vmatmul.mubr.msk.bf16.vlgmr.msra.gmra.mxu0 %vm59_vm1, %v1650_v62  ;;  %3503 = vmatprep.subr.bf16.mxu1 %v3901_v1  ;;  %v3722_v62 = vld [vmem:[%s4820_s6 + $0x8] sm:$0xff]   ;;  %v3723_v63 = vld [vmem:[%s4820_s6] sm:$0xff]  }
0x1bb6   :  { %v1646_v0 = vpop.f32.mrf.mxu1  ;;  %3470 = vmatpush3.bf16.msra.mxu0 %v3708_v61  ;;  %3477 = vmatprep.mubr.msk.bf16.mxu0 %vm3902_vm0, %v3901_v1  ;;  %v3721_v61 = vld [vmem:[%s4816_s2] sm:$0xff]  }
0x1bb7   :  { %3471 = vmatprep.subr.bf16.mxu0 %v3901_v1 }
0x1bb8   :  { %v3460_v3 = vpop.f32.mrf.mxu1  ;;  %3504 = vmatpush3.bf16.msra.mxu1 %v3721_v61  ;;  %v3732_v61 = vld [vmem:[%s4816_s2 + $0x28] sm:$0xff]  }
0x1bb9   :  { %3537 = vmatprep.subr.bf16.mxu1 %v3901_v1 }
0x1bba   :  { %3472 = vmatpush3.bf16.msra.mxu0 %v3709_v2 }
0x1bbb   :  { %3473 = vmatprep.subr.bf16.mxu0 %v3901_v1 }
0x1bbe   :  { %3474 = vmatpush3.bf16.msra.mxu0 %v3710_v5 }
0x1bbf   :  { %3475 = vmatprep.subr.bf16.mxu0 %v3901_v1 }
0x1bc2   :  { %3476 = vmatpush3.bf16.msra.mxu0 %v3711_v6 }
0x1bc3   :  { %3481 = vmatprep.subr.bf16.mxu0 %v3901_v1 }
0x1c75   :  { %v1704_v8 = vpop.f32.mrf.mxu0 }
0x1c76   :  { %v1710_v10 = vadd.f32 %v1704_v8, %v1649_v7  ;;  %v3724_v7 = vld [vmem:[%s4821_s7 + $0x18] sm:$0xff]  }
0x1c77   :  { %v3467_v12 = vpop.f32.mrf.mxu0 }
0x1c78   :  { %v1711_v13 = vmax.f32 %v1710_v10, 0.0 }
0x1c79   :  { %v1707_v4 = vpop.f32.mrf.mxu0 }
0x1c7a   :  { %v1712_v14 = vpack.c.bf16 %v1711_v13, %v1711_v13  ;;  %v3725_v13 = vld [vmem:[%s4821_s7 + $0x10] sm:$0xff]  }
0x1c7b   :  { %v3468_v17 = vpop.f32.mrf.mxu0 }
0x1c7c   :  { %v1717_v19 = vsel %vm59_vm1, %v1712_v14, %v1714_v16  ;;  %v3726_v14 = vld [vmem:[%s4821_s7 + $0x8] sm:$0xff]   ;;  %v3727_v16 = vld [vmem:[%s4821_s7] sm:$0xff]  }
0x1c7d   :  { %3478 = vmatmul.mubr.msk.bf16.vlgmr.msra.gmra.mxu0 %vm324_vm3, %v1717_v19  ;;  %v2003_v17 = vld [vmem:[%s4815_s1 + $0x5] sm:$0x1] }
0x1c7e   :  { %3485 = vmatprep.mubr.msk.bf16.mxu0 %vm3902_vm0, %v3901_v1  ;;  %3482 = vmatpush3.bf16.msra.mxu0 %v3712_v35 }
0x1c7f   :  { %3483 = vmatprep.subr.bf16.mxu0 %v3901_v1 }
0x1c82   :  { %3484 = vmatpush3.bf16.msra.mxu0 %v3713_v36 }
0x1c83   :  { %3509 = vmatprep.subr.bf16.mxu0 %v3901_v1 }
0x1d3d   :  { %v1786_v20 = vpop.f32.mrf.mxu0 }
0x1d3e   :  { %v1787_v11 = vadd.f32 %v1786_v20, %v4069_v51 }
0x1d3f   :  { %v3479_v21 = vpop.f32.mrf.mxu0 }
0x1d40   :  { %3812 = vtanh.f32 %v1787_v11  ;;  %v3020_v27 = vmul.f32 -1.442695, %v1787_v11 }
0x1d41   :  { %v1789_v23 = vpop.f32.mrf.mxu0 }
0x1d42   :  { %3814 = vpow2.f32 %v3020_v27 }
0x1d43   :  { %v3480_v24 = vpop.f32.mrf.mxu0 }
0x1d4d   :  { %v3813_v25 = vpop.eup %3812 }
0x1d4e   :  { %1801 = vrot.lane.b32.xlu1 %v3813_v25, %s3904_s19 }
0x1d4f   :  { %v3815_v28 = vpop.eup %3814 }
0x1d50   :  { %v1795_v18 = vadd.f32 1.0, %v3815_v28 }
0x1d52   :  { %3816 = vrcp.f32 %v1795_v18 }
0x1d5f   :  { %v3817_v29 = vpop.eup %3816 }
0x1d60   :  { %v1799_v33 = vmul.f32 %v3817_v29, %v4368_v26 }
0x1dc0   :  { %v1802_v31 = vpop.permute.xlu1 %1801 }
0x1dc1   :  { %v1804_v32 = vmul.f32 %v3817_v29, %v1802_v31 }
0x1dc3   :  { %1806 = vrot.lane.b32.xlu0 %v1804_v32, %s3903_s3 }
0x1e35   :  { %v1807_v51 = vpop.permute.xlu0 %1806 }
0x1e36   :  { %v4466_v34 = vadd.f32 %v1807_v51, %v1799_v33 }
0x1e38   :  { %3818 = vtanh.f32 %v4466_v34 }
0x1e45   :  { %v3819_v26 = vpop.eup %3818 }
0x1e46   :  { %1812 = vrot.lane.b32.xlu1 %v3819_v26, %s3904_s19 }
0x1eb8   :  { %v1813_v37 = vpop.permute.xlu1 %1812 }
0x1eb9   :  { %v4478_v38 = vmul.f32 %v3817_v29, %v1813_v37  ;;  %v4563_v29 = vld [vmem:[%s4822_s8] sm:$0x1] }
0x1ebb   :  { %v1821_v39 = vpack.c.bf16 %v4478_v38, %v4478_v38 }
0x1ebd   :  { %1828 = vrot.lane.b32.xlu0 %v1821_v39, %s3903_s3 }
0x1f2f   :  { %v1829_v40 = vpop.permute.xlu0 %1828 }
0x1f30   :  { %3486 = vmatmul.mubr.msk.bf16.vlgmr.msra.gmra.mxu0 %vm59_vm1, %v1829_v40 }
0x1f31   :  { %3513 = vmatprep.mubr.msk.bf16.mxu0 %vm3902_vm0, %v3901_v1  ;;  %3510 = vmatpush3.bf16.msra.mxu0 %v3722_v62  ;;  %v3733_v62 = vld [vmem:[%s4816_s2 + $0x20] sm:$0xff]  }
0x1f32   :  { %3511 = vmatprep.subr.bf16.mxu0 %v3901_v1 }
0x1f35   :  { %3512 = vmatpush3.bf16.msra.mxu0 %v3723_v63 }
0x1f36   :  { %3517 = vmatprep.subr.bf16.mxu0 %v3901_v1 }
0x1ff0   :  { %v1879_v42 = vpop.f32.mrf.mxu0 }
0x1ff1   :  { %v1885_v43 = vadd.f32 %v1879_v42, %v1822_v41 }
0x1ff2   :  { %v3487_v44 = vpop.f32.mrf.mxu0 }
0x1ff3   :  { %v1886_v45 = vsel %vm104_vm2, %v1885_v43, -inf }
0x1ff4   :  { %1887 = vmax.xlane.f32.xlu1 %v1886_v45  ;;  %v1882_v46 = vpop.f32.mrf.mxu0  ;;  %v3728_v45 = vld [vmem:[%s4819_s5 + $0x8] sm:$0xff]  }
0x1ff5   :  { %v3729_v46 = vld [vmem:[%s4819_s5] sm:$0xff]  }
0x1ff6   :  { %v3488_v47 = vpop.f32.mrf.mxu0 }
0x207d   :  { %v1888_v53 = vpop.xlane.xlu1 %1887 }
0x207e   :  { %v1889_v54 = vsub.f32 %v1885_v43, %v1888_v53 }
0x2080   :  { %v1890_v55 = vmul.f32 1.442695, %v1889_v54 }
0x2082   :  { %3820 = vpow2.f32 %v1890_v55 }
0x208f   :  { %v3821_v56 = vpop.eup %3820 }
0x2090   :  { %v1892_v57 = vsel %vm104_vm2, %v3821_v56, 0.0 }
0x2091   :  { %1893 = vadd.xlane.f32.xlu0 %v1892_v57 }
0x20a7   :  { %2067 = vrot.lane.b32.xlu0 %v1821_v39, %s3904_s19 }
0x211a   :  { %v1894_v0 = vpop.xlane.xlu0 %1893 }
0x211b   :  { %3822 = vrcp.f32 %v1894_v0 }
0x211e   :  { %v2068_v25 = vpop.permute.xlu0 %2067 }
0x2128   :  { %v3823_v2 = vpop.eup %3822 }
0x2129   :  { %v1896_v3 = vmul.f32 %v3823_v2, %v3821_v56 }
0x212b   :  { %1897 = vst [vmem:[#allocation2 + $0x5] sm:$0x1] %v1896_v3  ;;  %v1898_v5 = vpack.c.bf16 %v1896_v3, %v1896_v3 }
0x212d   :  { %3506 = vmatmul.mubr.bf16.vlgmr.msra.gmra.mxu1 %v1898_v5 }
0x212e   :  { %3553 = vmatprep.mubr.msk.bf16.mxu1 %vm3902_vm0, %v3901_v1  ;;  %3538 = vmatpush3.bf16.msra.mxu1 %v3730_v59 }
0x212f   :  { %3539 = vmatprep.subr.bf16.mxu1 %v3901_v1 }
0x2132   :  { %3540 = vmatpush3.bf16.msra.mxu1 %v3731_v60 }
0x2133   :  { %3541 = vmatprep.subr.bf16.mxu1 %v3901_v1 }
0x2136   :  { %3542 = vmatpush3.bf16.msra.mxu1 %v3732_v61 }
0x2137   :  { %3543 = vmatprep.subr.bf16.mxu1 %v3901_v1 }
0x213a   :  { %3544 = vmatpush3.bf16.msra.mxu1 %v3733_v62 }
0x213b   :  { %3545 = vmatprep.subr.bf16.mxu1 %v3901_v1 }
0x21ed   :  { %v1997_v6 = vpop.f32.mrf.mxu1 }
0x21ee   :  { %v2004_v8 = vpack.c.bf16 %v1997_v6, %v1997_v6  ;;  %v3734_v6 = vld [vmem:[%s4816_s2 + $0x18] sm:$0xff]  }
0x21ef   :  { %v3507_v10 = vpop.f32.mrf.mxu1  ;;  %3546 = vmatpush3.bf16.msra.mxu1 %v3734_v6 }
0x21f0   :  { %3514 = vmatmul.mubr.msk.bf16.vlgmr.msra.gmra.mxu0 %vm59_vm1, %v2004_v8  ;;  %3547 = vmatprep.subr.bf16.mxu1 %v3901_v1  ;;  %v3736_v8 = vld [vmem:[%s4816_s2 + $0x8] sm:$0xff]   ;;  %v3737_v10 = vld [vmem:[%s4816_s2] sm:$0xff]  }
0x21f1   :  { %v2000_v12 = vpop.f32.mrf.mxu1  ;;  %3518 = vmatpush3.bf16.msra.mxu0 %v3724_v7  ;;  %3525 = vmatprep.mubr.msk.bf16.mxu0 %vm3902_vm0, %v3901_v1  ;;  %v3735_v7 = vld [vmem:[%s4816_s2 + $0x10] sm:$0xff]  }
0x21f2   :  { %3519 = vmatprep.subr.bf16.mxu0 %v3901_v1  ;;  %v3738_v12 = vld [vmem:[%s4820_s6 + $0x8] sm:$0xff]  }
0x21f3   :  { %v3508_v4 = vpop.f32.mrf.mxu1  ;;  %3548 = vmatpush3.bf16.msra.mxu1 %v3735_v7 }
0x21f4   :  { %3549 = vmatprep.subr.bf16.mxu1 %v3901_v1 }
0x21f5   :  { %3520 = vmatpush3.bf16.msra.mxu0 %v3725_v13  ;;  %v3739_v13 = vld [vmem:[%s4820_s6] sm:$0xff]  }
0x21f6   :  { %3521 = vmatprep.subr.bf16.mxu0 %v3901_v1 }
0x21f7   :  { %3550 = vmatpush3.bf16.msra.mxu1 %v3736_v8  ;;  %v3746_v8 = vld [vmem:[%s4816_s2 + $0x38] sm:$0xff]  }
0x21f8   :  { %3551 = vmatprep.subr.bf16.mxu1 %v3901_v1 }
0x21f9   :  { %3522 = vmatpush3.bf16.msra.mxu0 %v3726_v14 }
0x21fa   :  { %3523 = vmatprep.subr.bf16.mxu0 %v3901_v1 }
0x21fb   :  { %3552 = vmatpush3.bf16.msra.mxu1 %v3737_v10  ;;  %v3747_v10 = vld [vmem:[%s4816_s2 + $0x30] sm:$0xff]  }
0x21fc   :  { %3585 = vmatprep.subr.bf16.mxu1 %v3901_v1 }
0x21fd   :  { %3524 = vmatpush3.bf16.msra.mxu0 %v3727_v16 }
0x21fe   :  { %3529 = vmatprep.subr.bf16.mxu0 %v3901_v1 }
0x22b0   :  { %v2058_v19 = vpop.f32.mrf.mxu0 }
0x22b1   :  { %v2064_v20 = vadd.f32 %v2058_v19, %v2003_v17 }
0x22b2   :  { %v3515_v11 = vpop.f32.mrf.mxu0 }
0x22b3   :  { %v2065_v21 = vmax.f32 %v2064_v20, 0.0  ;;  %v3740_v20 = vld [vmem:[%s4821_s7 + $0x18] sm:$0xff]  }
0x22b4   :  { %v2061_v23 = vpop.f32.mrf.mxu0 }
0x22b5   :  { %v2066_v24 = vpack.c.bf16 %v2065_v21, %v2065_v21 }
0x22b6   :  { %v3516_v27 = vpop.f32.mrf.mxu0 }
0x22b7   :  { %v2071_v28 = vsel %vm59_vm1, %v2066_v24, %v2068_v25  ;;  %v3741_v24 = vld [vmem:[%s4821_s7 + $0x10] sm:$0xff]   ;;  %v3742_v27 = vld [vmem:[%s4821_s7 + $0x8] sm:$0xff]  }
0x22b8   :  { %3526 = vmatmul.mubr.msk.bf16.vlgmr.msra.gmra.mxu0 %vm324_vm3, %v2071_v28  ;;  %v3743_v28 = vld [vmem:[%s4821_s7] sm:$0xff]  }
0x22b9   :  { %3533 = vmatprep.mubr.msk.bf16.mxu0 %vm3902_vm0, %v3901_v1  ;;  %3530 = vmatpush3.bf16.msra.mxu0 %v3728_v45 }
0x22ba   :  { %3531 = vmatprep.subr.bf16.mxu0 %v3901_v1 }
0x22bd   :  { %3532 = vmatpush3.bf16.msra.mxu0 %v3729_v46 }
0x22be   :  { %3557 = vmatprep.subr.bf16.mxu0 %v3901_v1 }
0x2378   :  { %v2140_v18 = vpop.f32.mrf.mxu0 }
0x2379   :  { %v2141_v31 = vadd.f32 %v4563_v29, %v2140_v18  ;;  %v2357_v18 = vld [vmem:[%s4815_s1 + $0x6] sm:$0x1] }
0x237a   :  { %v3527_v32 = vpop.f32.mrf.mxu0 }
0x237b   :  { %3824 = vtanh.f32 %v2141_v31  ;;  %v3040_v36 = vmul.f32 -1.442695, %v2141_v31 }
0x237c   :  { %v2143_v33 = vpop.f32.mrf.mxu0 }
0x237d   :  { %3826 = vpow2.f32 %v3040_v36 }
0x237e   :  { %v3528_v51 = vpop.f32.mrf.mxu0 }
0x2388   :  { %v3825_v35 = vpop.eup %3824 }
0x2389   :  { %2155 = vrot.lane.b32.xlu1 %v3825_v35, %s3904_s19 }
0x238a   :  { %v3827_v26 = vpop.eup %3826 }
0x238b   :  { %v2149_v37 = vadd.f32 1.0, %v3827_v26 }
0x238d   :  { %3828 = vrcp.f32 %v2149_v37 }
0x239a   :  { %v3829_v39 = vpop.eup %3828 }
0x239b   :  { %v2153_v42 = vmul.f32 %v3829_v39, %v4466_v34 }
0x23fb   :  { %v2156_v40 = vpop.permute.xlu1 %2155 }
0x23fc   :  { %v2158_v41 = vmul.f32 %v3829_v39, %v2156_v40 }
0x23fe   :  { %2160 = vrot.lane.b32.xlu1 %v2158_v41, %s3903_s3 }
0x2470   :  { %v2161_v43 = vpop.permute.xlu1 %2160 }
0x2471   :  { %v4569_v44 = vadd.f32 %v2161_v43, %v2153_v42 }
0x2473   :  { %3830 = vtanh.f32 %v4569_v44 }
0x2480   :  { %v3831_v34 = vpop.eup %3830 }
0x2481   :  { %2166 = vrot.lane.b32.xlu0 %v3831_v34, %s3904_s19 }
0x24f3   :  { %v2167_v47 = vpop.permute.xlu0 %2166 }
0x24f4   :  { %v4581_v48 = vmul.f32 %v3829_v39, %v2167_v47 }
0x24f6   :  { %v2175_v49 = vpack.c.bf16 %v4581_v48, %v4581_v48 }
0x24f8   :  { %2182 = vrot.lane.b32.xlu1 %v2175_v49, %s3903_s3 }
0x256a   :  { %v2183_v50 = vpop.permute.xlu1 %2182 }
0x256b   :  { %3534 = vmatmul.mubr.msk.bf16.vlgmr.msra.gmra.mxu0 %vm59_vm1, %v2183_v50 }
0x256c   :  { %3561 = vmatprep.mubr.msk.bf16.mxu0 %vm3902_vm0, %v3901_v1  ;;  %3558 = vmatpush3.bf16.msra.mxu0 %v3738_v12  ;;  %v3748_v12 = vld [vmem:[%s4816_s2 + $0x28] sm:$0xff]  }
0x256d   :  { %3559 = vmatprep.subr.bf16.mxu0 %v3901_v1 }
0x2570   :  { %3560 = vmatpush3.bf16.msra.mxu0 %v3739_v13  ;;  %v3749_v13 = vld [vmem:[%s4816_s2 + $0x20] sm:$0xff]  }
0x2571   :  { %3565 = vmatprep.subr.bf16.mxu0 %v3901_v1 }
0x262b   :  { %v2233_v53 = vpop.f32.mrf.mxu0 }
0x262c   :  { %v2239_v54 = vadd.f32 %v2233_v53, %v2176_v52 }
0x262d   :  { %v3535_v55 = vpop.f32.mrf.mxu0 }
0x262e   :  { %v2240_v56 = vsel %vm104_vm2, %v2239_v54, -inf }
0x262f   :  { %2241 = vmax.xlane.f32.xlu0 %v2240_v56  ;;  %v2236_v57 = vpop.f32.mrf.mxu0 }
0x2630   :  { %v3744_v57 = vld [vmem:[%s4819_s5 + $0x8] sm:$0xff]  }
0x2631   :  { %v3536_v58 = vpop.f32.mrf.mxu0 }
0x2632   :  { %v3745_v58 = vld [vmem:[%s4819_s5] sm:$0xff]  }
0x2645   :  { %2421 = vrot.lane.b32.xlu0 %v2175_v49, %s3904_s19 }
0x26b8   :  { %v2242_v63 = vpop.xlane.xlu0 %2241 }
0x26b9   :  { %v2243_v0 = vsub.f32 %v2239_v54, %v2242_v63  ;;  %v2530_v63 = vld [vmem:[%s4814_s0 + $0x7] sm:$0x1] }
0x26bb   :  { %v2244_v2 = vmul.f32 1.442695, %v2243_v0 }
0x26bc   :  { %v2422_v26 = vpop.permute.xlu0 %2421 }
0x26bd   :  { %3832 = vpow2.f32 %v2244_v2 }
0x26ca   :  { %v3833_v3 = vpop.eup %3832 }
0x26cb   :  { %v2246_v5 = vsel %vm104_vm2, %v3833_v3, 0.0 }
0x26cc   :  { %2247 = vadd.xlane.f32.xlu1 %v2246_v5 }
0x2755   :  { %v2248_v4 = vpop.xlane.xlu1 %2247 }
0x2756   :  { %3834 = vrcp.f32 %v2248_v4 }
0x2763   :  { %v3835_v14 = vpop.eup %3834 }
0x2764   :  { %v2250_v16 = vmul.f32 %v3835_v14, %v3833_v3 }
0x2766   :  { %2251 = vst [vmem:[#allocation2 + $0x6] sm:$0x1] %v2250_v16  ;;  %v2252_v17 = vpack.c.bf16 %v2250_v16, %v2250_v16 }
0x2768   :  { %3554 = vmatmul.mubr.bf16.vlgmr.msra.gmra.mxu1 %v2252_v17 }
0x2769   :  { %3601 = vmatprep.mubr.msk.bf16.mxu1 %vm3902_vm0, %v3901_v1  ;;  %3586 = vmatpush3.bf16.msra.mxu1 %v3746_v8 }
0x276a   :  { %3587 = vmatprep.subr.bf16.mxu1 %v3901_v1 }
0x276d   :  { %3588 = vmatpush3.bf16.msra.mxu1 %v3747_v10 }
0x276e   :  { %3589 = vmatprep.subr.bf16.mxu1 %v3901_v1 }
0x2771   :  { %3590 = vmatpush3.bf16.msra.mxu1 %v3748_v12 }
0x2772   :  { %3591 = vmatprep.subr.bf16.mxu1 %v3901_v1 }
0x2775   :  { %3592 = vmatpush3.bf16.msra.mxu1 %v3749_v13 }
0x2776   :  { %3593 = vmatprep.subr.bf16.mxu1 %v3901_v1 }
0x2828   :  { %v2351_v19 = vpop.f32.mrf.mxu1 }
0x2829   :  { %v2358_v11 = vpack.c.bf16 %v2351_v19, %v2351_v19 }
0x282a   :  { %v3555_v21 = vpop.f32.mrf.mxu1 }
0x282b   :  { %3562 = vmatmul.mubr.msk.bf16.vlgmr.msra.gmra.mxu0 %vm59_vm1, %v2358_v11  ;;  %v3751_v11 = vld [vmem:[%s4816_s2 + $0x10] sm:$0xff]   ;;  %v3752_v21 = vld [vmem:[%s4816_s2 + $0x8] sm:$0xff]  }
0x282c   :  { %v2354_v23 = vpop.f32.mrf.mxu1  ;;  %3566 = vmatpush3.bf16.msra.mxu0 %v3740_v20  ;;  %3573 = vmatprep.mubr.msk.bf16.mxu0 %vm3902_vm0, %v3901_v1  ;;  %v3750_v20 = vld [vmem:[%s4816_s2 + $0x18] sm:$0xff]  }
0x282d   :  { %3567 = vmatprep.subr.bf16.mxu0 %v3901_v1  ;;  %3594 = vmatpush3.bf16.msra.mxu1 %v3750_v20  ;;  %v3753_v23 = vld [vmem:[%s4816_s2] sm:$0xff]  }
0x282e   :  { %v3556_v25 = vpop.f32.mrf.mxu1  ;;  %3595 = vmatprep.subr.bf16.mxu1 %v3901_v1 }
0x282f   :  { %v3755_v25 = vld [vmem:[%s4820_s6] sm:$0xff]  }
0x2830   :  { %3568 = vmatpush3.bf16.msra.mxu0 %v3741_v24  ;;  %v3754_v24 = vld [vmem:[%s4820_s6 + $0x8] sm:$0xff]  }
0x2831   :  { %3569 = vmatprep.subr.bf16.mxu0 %v3901_v1  ;;  %3596 = vmatpush3.bf16.msra.mxu1 %v3751_v11 }
0x2832   :  { %3597 = vmatprep.subr.bf16.mxu1 %v3901_v1 }
0x2834   :  { %3570 = vmatpush3.bf16.msra.mxu0 %v3742_v27 }
0x2835   :  { %3571 = vmatprep.subr.bf16.mxu0 %v3901_v1  ;;  %3598 = vmatpush3.bf16.msra.mxu1 %v3752_v21 }
0x2836   :  { %3599 = vmatprep.subr.bf16.mxu1 %v3901_v1 }
0x2838   :  { %3572 = vmatpush3.bf16.msra.mxu0 %v3743_v28 }
0x2839   :  { %3577 = vmatprep.subr.bf16.mxu0 %v3901_v1  ;;  %3600 = vmatpush3.bf16.msra.mxu1 %v3753_v23 }
0x28eb   :  { %v2412_v31 = vpop.f32.mrf.mxu0 }
0x28ec   :  { %v2418_v32 = vadd.f32 %v2412_v31, %v2357_v18 }
0x28ed   :  { %v3563_v33 = vpop.f32.mrf.mxu0 }
0x28ee   :  { %v2419_v51 = vmax.f32 %v2418_v32, 0.0  ;;  %v3756_v33 = vld [vmem:[%s4821_s7 + $0x18] sm:$0xff]  }
0x28ef   :  { %v2415_v35 = vpop.f32.mrf.mxu0 }
0x28f0   :  { %v2420_v36 = vpack.c.bf16 %v2419_v51, %v2419_v51 }
0x28f1   :  { %v3564_v37 = vpop.f32.mrf.mxu0 }
0x28f2   :  { %v2425_v39 = vsel %vm59_vm1, %v2420_v36, %v2422_v26  ;;  %v3757_v26 = vld [vmem:[%s4821_s7 + $0x10] sm:$0xff]  }
0x28f3   :  { %3574 = vmatmul.mubr.msk.bf16.vlgmr.msra.gmra.mxu0 %vm324_vm3, %v2425_v39  ;;  %v3758_v39 = vld [vmem:[%s4821_s7 + $0x8] sm:$0xff]  }
0x28f4   :  { %3581 = vmatprep.mubr.msk.bf16.mxu0 %vm3902_vm0, %v3901_v1  ;;  %3578 = vmatpush3.bf16.msra.mxu0 %v3744_v57 }
0x28f5   :  { %3579 = vmatprep.subr.bf16.mxu0 %v3901_v1 }
0x28f8   :  { %3580 = vmatpush3.bf16.msra.mxu0 %v3745_v58 }
0x28f9   :  { %3605 = vmatprep.subr.bf16.mxu0 %v3901_v1 }
0x29b3   :  { %v2494_v40 = vpop.f32.mrf.mxu0 }
0x29b4   :  { %v2495_v41 = vadd.f32 %v4563_v29, %v2494_v40  ;;  %v3759_v40 = vld [vmem:[%s4821_s7] sm:$0xff]   ;;  %s3906_s7 = smov [#allocation2]  }
0x29b5   :  { %v3575_v42 = vpop.f32.mrf.mxu0  ;;  %s2894_s17 = sshll.u32 %s3906_s7, 4  ;;  %s2895_s17 = int_to_ptr.vmem [resolvable:$true] %s2894_s17 }
0x29b6   :  { %3836 = vtanh.f32 %v2495_v41  ;;  %v3060_v34 = vmul.f32 -1.442695, %v2495_v41  ;;  %v2711_v41 = vld [vmem:[%s4815_s1 + $0x7] sm:$0x1]  ;;  %s3905_s1 = smov 96   ;;  %s3857_s18 = scalar_lea.vmem %s2895_s17, 128 }
0x29b7   :  { %v2497_v43 = vpop.f32.mrf.mxu0  ;;  %p3858_p0 = scmp.ne.s32.totalorder %s2895_s17, %s3857_s18  ;;  %p3862_p1 = scmp.lt.s32.totalorder %s2895_s17, %s2895_s17 }
0x29b8   :  { %3838 = vpow2.f32 %v3060_v34  ;;  %p3863_p2 = scmp.lt.s32.totalorder %s3857_s18, %s3857_s18 }
0x29b9   :  { %v3576_v45 = vpop.f32.mrf.mxu0 }
0x29ba   :  { %p3864_p3 = por %p3863_p2, %p3862_p1 }
0x29bc   :  { %p3865_p4 = pnand %p3864_p3, %p3858_p0 }
0x29c3   :  { %v3837_v46 = vpop.eup %3836 }
0x29c4   :  { %2509 = vrot.lane.b32.xlu1 %v3837_v46, %s3904_s19 }
0x29c5   :  { %v3839_v47 = vpop.eup %3838 }
0x29c6   :  { %v2503_v49 = vadd.f32 1.0, %v3839_v47 }
0x29c8   :  { %3840 = vrcp.f32 %v2503_v49 }
0x29d5   :  { %v3841_v50 = vpop.eup %3840 }
0x29d6   :  { %v2507_v54 = vmul.f32 %v3841_v50, %v4569_v44 }
0x2a36   :  { %v2510_v52 = vpop.permute.xlu1 %2509 }
0x2a37   :  { %v2512_v53 = vmul.f32 %v3841_v50, %v2510_v52 }
0x2a39   :  { %2514 = vrot.lane.b32.xlu0 %v2512_v53, %s3903_s3 }
0x2aab   :  { %v2515_v55 = vpop.permute.xlu0 %2514 }
0x2aac   :  { %v4667_v56 = vadd.f32 %v2515_v55, %v2507_v54 }
0x2aae   :  { %3842 = vtanh.f32 %v4667_v56 }
0x2abb   :  { %v3843_v44 = vpop.eup %3842 }
0x2abc   :  { %2520 = vrot.lane.b32.xlu1 %v3843_v44, %s3904_s19 }
0x2b2e   :  { %v2521_v59 = vpop.permute.xlu1 %2520 }
0x2b2f   :  { %v4679_v60 = vmul.f32 %v3841_v50, %v2521_v59 }
0x2b31   :  { %v2529_v61 = vpack.c.bf16 %v4679_v60, %v4679_v60 }
0x2b33   :  { %2536 = vrot.lane.b32.xlu0 %v2529_v61, %s3903_s3 }
0x2ba5   :  { %v2537_v62 = vpop.permute.xlu0 %2536 }
0x2ba6   :  { %3582 = vmatmul.mubr.msk.bf16.vlgmr.msra.gmra.mxu0 %vm59_vm1, %v2537_v62 }
0x2ba7   :  { %3609 = vmatprep.mubr.msk.bf16.mxu0 %vm3902_vm0, %v3901_v1  ;;  %3606 = vmatpush3.bf16.msra.mxu0 %v3754_v24 }
0x2ba8   :  { %3607 = vmatprep.subr.bf16.mxu0 %v3901_v1 }
0x2bab   :  { %3608 = vmatpush3.bf16.msra.mxu0 %v3755_v25 }
0x2bac   :  { %3613 = vmatprep.subr.bf16.mxu0 %v3901_v1 }
0x2c66   :  { %v2587_v0 = vpop.f32.mrf.mxu0 }
0x2c67   :  { %v2593_v2 = vadd.f32 %v2587_v0, %v2530_v63 }
0x2c68   :  { %v3583_v3 = vpop.f32.mrf.mxu0 }
0x2c69   :  { %v2594_v5 = vsel %vm104_vm2, %v2593_v2, -inf }
0x2c6a   :  { %2595 = vmax.xlane.f32.xlu1 %v2594_v5  ;;  %v2590_v6 = vpop.f32.mrf.mxu0 }
0x2c6c   :  { %v3584_v7 = vpop.f32.mrf.mxu0 }
0x2cf3   :  { %v2596_v4 = vpop.xlane.xlu1 %2595 }
0x2cf4   :  { %v2597_v14 = vsub.f32 %v2593_v2, %v2596_v4 }
0x2cf6   :  { %v2598_v16 = vmul.f32 1.442695, %v2597_v14 }
0x2cf8   :  { %3844 = vpow2.f32 %v2598_v16 }
0x2d05   :  { %v3845_v17 = vpop.eup %3844 }
0x2d06   :  { %v2600_v19 = vsel %vm104_vm2, %v3845_v17, 0.0 }
0x2d07   :  { %2601 = vadd.xlane.f32.xlu0 %v2600_v19 }
0x2d1d   :  { %2775 = vrot.lane.b32.xlu0 %v2529_v61, %s3904_s19 }
0x2d90   :  { %v2602_v27 = vpop.xlane.xlu0 %2601 }
0x2d91   :  { %3846 = vrcp.f32 %v2602_v27 }
0x2d94   :  { %v2776_v49 = vpop.permute.xlu0 %2775 }
0x2d9e   :  { %v3847_v28 = vpop.eup %3846 }
0x2d9f   :  { %v2604_v18 = vmul.f32 %v3847_v28, %v3845_v17 }
0x2da1   :  { %2605 = vst [vmem:[#allocation2 + $0x7] sm:$0x1] %v2604_v18  ;;  %v2606_v31 = vpack.c.bf16 %v2604_v18, %v2604_v18 }
0x2da3   :  { %3602 = vmatmul.mubr.bf16.vlgmr.msra.gmra.mxu1 %v2606_v31 }
0x2e63   :  { %v2705_v32 = vpop.f32.mrf.mxu1 }
0x2e64   :  { %v2712_v51 = vpack.c.bf16 %v2705_v32, %v2705_v32 }
0x2e65   :  { %v3603_v35 = vpop.f32.mrf.mxu1 }
0x2e66   :  { %3610 = vmatmul.mubr.msk.bf16.vlgmr.msra.gmra.mxu0 %vm59_vm1, %v2712_v51 }
0x2e67   :  { %v2708_v36 = vpop.f32.mrf.mxu1  ;;  %3614 = vmatpush3.bf16.msra.mxu0 %v3756_v33  ;;  %3621 = vmatprep.mubr.msk.bf16.mxu0 %vm3902_vm0, %v3901_v1 }
0x2e68   :  { %3615 = vmatprep.subr.bf16.mxu0 %v3901_v1 }
0x2e69   :  { %v3604_v37 = vpop.f32.mrf.mxu1 }
0x2e6b   :  { %3616 = vmatpush3.bf16.msra.mxu0 %v3757_v26 }
0x2e6c   :  { %3617 = vmatprep.subr.bf16.mxu0 %v3901_v1 }
0x2e6f   :  { %3618 = vmatpush3.bf16.msra.mxu0 %v3758_v39 }
0x2e70   :  { %3619 = vmatprep.subr.bf16.mxu0 %v3901_v1 }
0x2e73   :  { %3620 = vmatpush3.bf16.msra.mxu0 %v3759_v40 }
0x2f26   :  { %v2766_v42 = vpop.f32.mrf.mxu0 }
0x2f27   :  { %v2772_v43 = vadd.f32 %v2766_v42, %v2711_v41 }
0x2f28   :  { %v3611_v45 = vpop.f32.mrf.mxu0 }
0x2f29   :  { %v2773_v46 = vmax.f32 %v2772_v43, 0.0 }
0x2f2a   :  { %v2769_v34 = vpop.f32.mrf.mxu0 }
0x2f2b   :  { %v2774_v47 = vpack.c.bf16 %v2773_v46, %v2773_v46 }
0x2f2c   :  { %v3612_v50 = vpop.f32.mrf.mxu0 }
0x2f2d   :  { %v2779_v52 = vsel %vm59_vm1, %v2774_v47, %v2776_v49 }
0x2f2e   :  { %3622 = vmatmul.mubr.msk.bf16.vlgmr.msra.gmra.mxu0 %vm324_vm3, %v2779_v52 }
0x2fee   :  { %v2848_v1 = vpop.f32.mrf.mxu0 }
0x2fef   :  { %v2849_v53 = vadd.f32 %v4563_v29, %v2848_v1 }
0x2ff0   :  { %v3623_v54 = vpop.f32.mrf.mxu0 }
0x2ff1   :  { %3848 = vtanh.f32 %v2849_v53  ;;  %v3080_v44 = vmul.f32 -1.442695, %v2849_v53 }
0x2ff2   :  { %v2851_v55 = vpop.f32.mrf.mxu0 }
0x2ff3   :  { %3850 = vpow2.f32 %v3080_v44 }
0x2ff4   :  { %v3624_v57 = vpop.f32.mrf.mxu0 }
0x2ffe   :  { %v3849_v58 = vpop.eup %3848 }
0x2fff   :  { %2863 = vrot.lane.b32.xlu1 %v3849_v58, %s3904_s19 }
0x3000   :  { %v3851_v59 = vpop.eup %3850 }
0x3001   :  { %v2857_v61 = vadd.f32 1.0, %v3851_v59 }
0x3003   :  { %3852 = vrcp.f32 %v2857_v61 }
0x3010   :  { %v3853_v62 = vpop.eup %3852 }
0x3011   :  { %v2861_v2 = vmul.f32 %v3853_v62, %v4667_v56 }
0x3071   :  { %v2864_v63 = vpop.permute.xlu1 %2863 }
0x3072   :  { %v2866_v0 = vmul.f32 %v3853_v62, %v2864_v63 }
0x3074   :  { %2868 = vrot.lane.b32.xlu1 %v2866_v0, %s3903_s3 }
0x30e6   :  { %v2869_v29 = vpop.permute.xlu1 %2868 }
0x30e7   :  { %v2871_v3 = vadd.f32 %v2869_v29, %v2861_v2 }
0x30e9   :  { %3854 = vtanh.f32 %v2871_v3  ;;  %2884 = vrot.lane.b32.xlu1 %v2871_v3, %s3905_s1 }
0x30ed   :  { %755 = vrot.lane.b32.xlu1 %v4184_v15, %s3903_s3 }
0x30f1   :  { %1463 = vrot.lane.b32.xlu1 %v4380_v30, %s3903_s3 }
0x30f5   :  { %2171 = vrot.lane.b32.xlu1 %v4581_v48, %s3903_s3 }
0x30f6   :  { %v3855_v5 = vpop.eup %3854 }
0x30f7   :  { %2874 = vrot.lane.b32.xlu0 %v3855_v5, %s3904_s19  ;;  %s2906_s19 = sshll.u32 %s3907_s4, 4  ;;  %s2907_s19 = int_to_ptr.vmem [resolvable:$true] %s2906_s19 }
0x30fb   :  { %400 = vrot.lane.b32.xlu0 %v4086_v9, %s3903_s3 }
0x30ff   :  { %1109 = vrot.lane.b32.xlu0 %v4282_v22, %s3903_s3 }
0x3103   :  { %1817 = vrot.lane.b32.xlu0 %v4478_v38, %s3903_s3 }
0x3107   :  { %2525 = vrot.lane.b32.xlu0 %v4679_v60, %s3903_s3 }
0x315b   :  { %v2885_v15 = vpop.permute.xlu1 %2884 }
0x315c   :  { %2887 = vst.msk [vmem:[#allocation4] sm:$0x1] %vm403_vm4, %v2885_v15 }
0x315f   :  { %v756_v9 = vpop.permute.xlu1 %755 }
0x3160   :  { %3868 = shalt.err (!%p3865_p4)
}
0x3161   :  { %2897 = dma.vmem_to_hbm [thread:$0]  %s2895_s17, 128, %s4823_s9, [#allocation3]   ;;  %758 = vst.msk [vmem:[%s4824_s10 + $0x1] sm:$0x1] %vm403_vm4, %v756_v9 }
0x3162   :  { %s3877_s24 = scalar_lea.vmem %s2907_s19, 16  ;;  %s3881_s25 = scalar_lea.vmem %s2907_s19, 32 }
0x3163   :  { %p3878_p5 = scmp.ne.s32.totalorder %s2907_s19, %s3877_s24  ;;  %p3882_p6 = scmp.lt.s32.totalorder %s2907_s19, %s2907_s19 }
0x3164   :  { %p3883_p7 = scmp.lt.s32.totalorder %s3881_s25, %s3877_s24 }
0x3166   :  { %p3884_p8 = por %p3883_p7, %p3882_p6 }
0x3168   :  { %p3885_p9 = pnand %p3884_p8, %p3878_p5 }
0x316a   :  { %3888 = shalt.err (!%p3885_p9)
}
0x316b   :  { %2909 = dma.vmem_to_hbm [thread:$0]  %s2907_s19, 16, %s4825_s11, [#allocation5]   ;;  %v1464_v22 = vpop.permute.xlu1 %1463  ;;  %v2875_v38 = vpop.permute.xlu0 %2874 }
0x316c   :  { %1466 = vst.msk [vmem:[%s4824_s10 + $0x3] sm:$0x1] %vm403_vm4, %v1464_v22  ;;  %v2877_v48 = vmul.f32 %v3853_v62, %v2875_v38 }
0x316e   :  { %2879 = vrot.lane.b32.xlu1 %v2877_v48, %s3903_s3 }
0x316f   :  { %v2172_v30 = vpop.permute.xlu1 %2171  ;;  %v401_v56 = vpop.permute.xlu0 %400 }
0x3170   :  { %2174 = vst.msk [vmem:[%s4824_s10 + $0x5] sm:$0x1] %vm403_vm4, %v2172_v30  ;;  %404 = vst.msk [vmem:[%s4824_s10] sm:$0x1] %vm403_vm4, %v401_v56 }
0x3173   :  { %v1110_v60 = vpop.permute.xlu0 %1109 }
0x3174   :  { %1112 = vst.msk [vmem:[%s4824_s10 + $0x2] sm:$0x1] %vm403_vm4, %v1110_v60 }
0x3177   :  { %v1818_v6 = vpop.permute.xlu0 %1817 }
0x3178   :  { %1820 = vst.msk [vmem:[%s4824_s10 + $0x4] sm:$0x1] %vm403_vm4, %v1818_v6 }
0x317b   :  { %v2526_v7 = vpop.permute.xlu0 %2525 }
0x317c   :  { %2528 = vst.msk [vmem:[%s4824_s10 + $0x6] sm:$0x1] %vm403_vm4, %v2526_v7 }
0x31e0   :  { %v2880_v8 = vpop.permute.xlu1 %2879 }
0x31e1   :  { %2882 = vst.msk [vmem:[%s4824_s10 + $0x7] sm:$0x1] %vm403_vm4, %v2880_v8 }
0x31e2   :  { %3897 = dma.done.wait [#allocation3], 128  }
0x31e3   :  { %3898 = vsyncadd [#allocation3], 4294967168 }
0x31e4   :  { %3899 = dma.done.wait [#allocation5], 16  }
0x31e5   :  { %3900 = vsyncadd [#allocation5], 4294967280 }
0x31e6   :  { %2918 = vsyncpa [#allocation3], 1 }
0x31e7   :  { %2919 = vsyncpa [#allocation5], 1 }

</bundles_post_ra>
